<compile_context>
chip_gen: v7x
topology: tpu7x:2x2x1
jax: 0.10.0
libtpu: 0.0.40
codegen_flags: <defaults>
</compile_context>

<pallas_src>
import functools
from typing import NamedTuple

import jax
import jax.numpy as jnp
from jax.experimental import pallas as pl
from jax.experimental.pallas import tpu as pltpu


# ----------------------------------------------------------------------------
# Pallas kernels
# ----------------------------------------------------------------------------
def _matmul_bias_kernel(x_ref, w_ref, b_ref, o_ref, acc_ref, *, apply_relu):
    """out = relu?(X @ W + b); one (bm, bn) tile, grid axis 2 is K reduction."""

    @pl.when(pl.program_id(2) == 0)
    def _():
        acc_ref[...] = jnp.zeros_like(acc_ref)

    acc_ref[...] += jnp.dot(x_ref[...], w_ref[...],
                            preferred_element_type=jnp.float32)

    @pl.when(pl.program_id(2) == pl.num_programs(2) - 1)
    def _():
        out = acc_ref[...] + b_ref[...]          # (1, bn) broadcast over rows
        if apply_relu:
            out = jnp.maximum(out, 0.0)
        o_ref[...] = out.astype(o_ref.dtype)


def _matmul_bias_single_k_kernel(x_ref, w_ref, b_ref, o_ref, *, apply_relu):
    """Single-K-step fast path: no f32 accumulator scratch, write directly."""
    out = jnp.dot(x_ref[...], w_ref[...],
                  preferred_element_type=jnp.float32) + b_ref[...]
    if apply_relu:
        out = jnp.maximum(out, 0.0)
    o_ref[...] = out.astype(o_ref.dtype)


def _fused_tail_kernel(p_ref, w3_ref, b3_ref, w4_ref, b4_ref, w5_ref, b5_ref,
                       o_ref):
    """conv3 (1x1 spatial) + head-1 + head-2 as a 3-layer MLP, all in VMEM."""
    a = jnp.dot(p_ref[...], w3_ref[...],
                preferred_element_type=jnp.float32) + b3_ref[...]
    a = jnp.maximum(a, 0.0).astype(jnp.bfloat16)
    h = jnp.dot(a, w4_ref[...],
                preferred_element_type=jnp.float32) + b4_ref[...]
    h = jnp.maximum(h, 0.0).astype(jnp.bfloat16)
    o_ref[...] = jnp.dot(h, w5_ref[...],
                         preferred_element_type=jnp.float32) + b5_ref[...]


# ----------------------------------------------------------------------------
# Tiled linear wrapper (pre-padded bf16 weights, padded f32 row bias)
# ----------------------------------------------------------------------------
def _round_up(v, m):
    return -(-v // m) * m


def _pick_block(dim, candidates):
    for c in candidates:
        if dim % c == 0:
            return c
    return candidates[-1]


def pallas_linear(x, wp, bp, n_out, *, relu, out_dtype=jnp.float32):
    """x: (M, K); wp: (Kp, Np) bf16 (zero-padded, prepared once); bp: (1, Np)
    f32.  Returns (M, n_out) in out_dtype."""
    M, K = x.shape
    Kp, Np = wp.shape
    assert K <= Kp and n_out <= Np, (x.shape, wp.shape, n_out)
    Mp = _round_up(M, 128)

    xp = x.astype(jnp.bfloat16)
    if Mp != M or Kp != K:
        xp = jnp.pad(xp, ((0, Mp - M), (0, Kp - K)))

    bn = _pick_block(Np, (256, 128))
    bk = _pick_block(Kp, (512, 256, 128))
    # Biggest M tile that divides Mp, but keep >=2 total parallel tiles when
    # possible so both TensorCores get work on v7x.
    bm_cands = [c for c in (1024, 512, 256, 128) if Mp % c == 0]
    bm = bm_cands[0]
    if (Mp // bm) * (Np // bn) < 2:
        for c in bm_cands:
            if (Mp // c) * (Np // bn) >= 2:
                bm = c
                break

    grid = (Mp // bm, Np // bn, Kp // bk)
    single_k = grid[2] == 1
    if single_k:
        kernel = functools.partial(_matmul_bias_single_k_kernel, apply_relu=relu)
        scratch = ()
    else:
        kernel = functools.partial(_matmul_bias_kernel, apply_relu=relu)
        scratch = (pltpu.VMEM((bm, bn), jnp.float32),)

    out = pl.pallas_call(
        kernel,
        out_shape=jax.ShapeDtypeStruct((Mp, Np), out_dtype),
        grid=grid,
        in_specs=[
            pl.BlockSpec((bm, bk), lambda i, j, k: (i, k)),   # X row tile
            pl.BlockSpec((bk, bn), lambda i, j, k: (k, j)),   # W col tile
            pl.BlockSpec((1, bn), lambda i, j, k: (0, j)),    # bias tile
        ],
        out_specs=pl.BlockSpec((bm, bn), lambda i, j, k: (i, j)),
        scratch_shapes=scratch,
        compiler_params=pltpu.CompilerParams(
            dimension_semantics=("parallel", "parallel", "arbitrary"),
            vmem_limit_bytes=32 * 1024 * 1024),
    )(xp, wp, bp)

    if Mp != M or Np != n_out:
        out = out[:M, :n_out]
    return out


# ----------------------------------------------------------------------------
# NHWC im2col + conv wrapper (layout-only slicing, stays in bf16)
# ----------------------------------------------------------------------------
def _im2col_nhwc(x, kh, kw, stride):
    """x: (B, H, W, C) -> (B*oh*ow, kh*kw*C), last dim in (kh, kw, C) order."""
    B, H, W, C = x.shape
    oh = (H - kh) // stride + 1
    ow = (W - kw) // stride + 1
    cols = []
    for i in range(kh):
        for j in range(kw):
            cols.append(x[:, i:i + stride * oh:stride,
                          j:j + stride * ow:stride, :])
    patches = jnp.concatenate(cols, axis=-1)            # (B, oh, ow, kh*kw*C)
    return patches.reshape(B * oh * ow, kh * kw * C), oh, ow


def conv2d_nhwc(x, wp, bp, n_out, *, kh, kw, stride):
    """Valid NHWC conv via im2col + fused matmul/bias/ReLU kernel."""
    B = x.shape[0]
    patches, oh, ow = _im2col_nhwc(x, kh, kw, stride)
    y = pallas_linear(patches, wp, bp, n_out, relu=True, out_dtype=jnp.bfloat16)
    return y.reshape(B, oh, ow, n_out)


# ----------------------------------------------------------------------------
# Parameters: init + one-time preparation
# ----------------------------------------------------------------------------
class A2CConfig(NamedTuple):
    n_actions: int
    fused_tail: bool


def _conv_spatial(input_shape):
    h, w = input_shape[1], input_shape[2]
    h, w = (h - 8) // 4 + 1, (w - 8) // 4 + 1
    h, w = (h - 4) // 2 + 1, (w - 4) // 2 + 1
    h, w = (h - 3) // 1 + 1, (w - 3) // 1 + 1
    return h, w


def init_params(key, input_shape, n_actions):
    c_in = input_shape[0]

    def dense(k, shape, scale=0.05):
        return scale * jax.random.normal(k, shape, dtype=jnp.float32)

    ks = jax.random.split(key, 14)
    oh3, ow3 = _conv_spatial(input_shape)
    conv_out_size = 64 * oh3 * ow3
    return {
        "conv1_w": dense(ks[0], (32, c_in, 8, 8)),
        "conv1_b": dense(ks[1], (32,)),
        "conv2_w": dense(ks[2], (64, 32, 4, 4)),
        "conv2_b": dense(ks[3], (64,)),
        "conv3_w": dense(ks[4], (64, 64, 3, 3)),
        "conv3_b": dense(ks[5], (64,)),
        "pol1_w": dense(ks[6], (conv_out_size, 512)),
        "pol1_b": dense(ks[7], (512,)),
        "pol2_w": dense(ks[8], (512, n_actions)),
        "pol2_b": dense(ks[9], (n_actions,)),
        "val1_w": dense(ks[10], (conv_out_size, 512)),
        "val1_b": dense(ks[11], (512,)),
        "val2_w": dense(ks[12], (512, 1)),
        "val2_b": dense(ks[13], (1,)),
    }


def _conv_w_to_mat(w):
    """(outC, inC, kh, kw) -> (kh*kw*inC, outC), matching NHWC im2col order."""
    out_c, in_c, kh, kw = w.shape
    return jnp.transpose(w, (2, 3, 1, 0)).reshape(kh * kw * in_c, out_c)


def _prep_matmul_w(w2d):
    K, N = w2d.shape
    Kp, Np = _round_up(K, 128), _round_up(N, 128)
    return jnp.pad(w2d, ((0, Kp - K), (0, Np - N))).astype(jnp.bfloat16)


def _prep_bias(b):
    N = b.shape[0]
    Np = _round_up(N, 128)
    return jnp.pad(b.astype(jnp.float32), (0, Np - N)).reshape(1, Np)


def prepare_params(params, input_shape, n_actions):
    """One-time weight preparation.  Returns (weights, cfg); `weights` holds
    only kernel-ready arrays (bf16, zero-padded, matmul layout)."""
    oh3, ow3 = _conv_spatial(input_shape)
    c3_out = params["conv3_w"].shape[0]
    conv_out = c3_out * oh3 * ow3
    hid = params["pol1_w"].shape[1]
    assert params["pol1_w"].shape[0] == conv_out
    assert n_actions + 1 <= 128

    w = {}
    # conv1: fold the x/256 input normalization into the weights (exact in f32,
    # then a single bf16 rounding — ~1 ulp vs round-then-scale).
    c1 = _conv_w_to_mat(params["conv1_w"]) * (1.0 / 256.0)
    w["c1_w"] = _prep_matmul_w(c1)
    w["c1_b"] = _prep_bias(params["conv1_b"])
    c2 = _conv_w_to_mat(params["conv2_w"])
    w["c2_w"] = _prep_matmul_w(c2)
    w["c2_b"] = _prep_bias(params["conv2_b"])
    c3 = _conv_w_to_mat(params["conv3_w"])

    # Head-1 rows permuted from NCHW flatten (PyTorch .view) to NHWC flatten;
    # policy/value first layers fused into one (conv_out, 2*hid) matmul.
    idx = jnp.arange(conv_out).reshape(c3_out, oh3, ow3).transpose(1, 2, 0).reshape(-1)
    h1_w = jnp.concatenate([params["pol1_w"][idx], params["val1_w"][idx]], axis=1)
    h1_b = jnp.concatenate([params["pol1_b"], params["val1_b"]], axis=0)

    # Head-2 as a block-diagonal (2*hid, 128) matmul -> lane-dense output.
    h2_w = jnp.zeros((2 * hid, 128), jnp.float32)
    h2_w = h2_w.at[:hid, :n_actions].set(params["pol2_w"])
    h2_w = h2_w.at[hid:, n_actions:n_actions + 1].set(params["val2_w"])
    h2_b = jnp.zeros((128,), jnp.float32)
    h2_b = h2_b.at[:n_actions].set(params["pol2_b"])
    h2_b = h2_b.at[n_actions:n_actions + 1].set(params["val2_b"])
    w["h2_w"] = h2_w.astype(jnp.bfloat16)
    w["h2_b"] = h2_b.reshape(1, 128)

    fused_tail = (oh3 == 1 and ow3 == 1)
    if fused_tail:
        # conv3 + heads run as one fused kernel: keep unpadded full-array
        # operands (each is a single VMEM tile).
        w["c3_w"] = c3.astype(jnp.bfloat16)                       # (9*64, 64)
        w["c3_b"] = params["conv3_b"].astype(jnp.float32).reshape(1, -1)
        w["h1_w"] = h1_w.astype(jnp.bfloat16)                     # (64, 1024)
        w["h1_b"] = h1_b.astype(jnp.float32).reshape(1, -1)
    else:
        w["c3_w"] = _prep_matmul_w(c3)
        w["c3_b"] = _prep_bias(params["conv3_b"])
        w["h1_w"] = _prep_matmul_w(h1_w)
        w["h1_b"] = _prep_bias(h1_b)

    return w, A2CConfig(n_actions=n_actions, fused_tail=fused_tail)


# ----------------------------------------------------------------------------
# Forward
# ----------------------------------------------------------------------------
def atari_a2c_forward(weights, x, *, cfg):
    """x: (B, C, H, W) uint8.  Returns (policy_logits, value) in f32."""
    w = weights
    B = x.shape[0]
    # x.float()/256 is folded into conv1's weights; uint8 is exact in bf16.
    fx = jnp.transpose(x, (0, 2, 3, 1)).astype(jnp.bfloat16)      # NHWC

    h = conv2d_nhwc(fx, w["c1_w"], w["c1_b"], 32, kh=8, kw=8, stride=4)
    h = conv2d_nhwc(h, w["c2_w"], w["c2_b"], 64, kh=4, kw=4, stride=2)

    if cfg.fused_tail:
        # conv3 output is 1x1 spatial, so conv3 + head1 + head2 is a 3-layer
        # MLP over the flattened conv2 output -> one pallas_call, no HBM
        # round trips for the intermediate activations.
        p3 = h.reshape(B, -1)
        Bp = _round_up(B, 8)
        if Bp != B:
            p3 = jnp.pad(p3, ((0, Bp - B), (0, 0)))
        heads = pl.pallas_call(
            _fused_tail_kernel,
            out_shape=jax.ShapeDtypeStruct((Bp, w["h2_w"].shape[1]), jnp.float32),
        )(p3, w["c3_w"], w["c3_b"], w["h1_w"], w["h1_b"], w["h2_w"], w["h2_b"])
        heads = heads[:B]
    else:
        h = conv2d_nhwc(h, w["c3_w"], w["c3_b"], 64, kh=3, kw=3, stride=1)
        conv_out = h.reshape(B, -1)
        hidden = pallas_linear(conv_out, w["h1_w"], w["h1_b"], w["h1_w"].shape[1],
                               relu=True, out_dtype=jnp.bfloat16)
        heads = pallas_linear(hidden, w["h2_w"], w["h2_b"], cfg.n_actions + 1,
                              relu=False, out_dtype=jnp.float32)

    policy = heads[:, :cfg.n_actions]
    value = heads[:, cfg.n_actions:cfg.n_actions + 1]
    return policy, value


if __name__ == "__main__":
    # 4 stacked frames, 36x36 spatial (smallest size surviving the three valid
    # convs), batch=2, 6 actions.
    input_shape = (4, 36, 36)
    n_actions = 6
    batch = 2

    key = jax.random.PRNGKey(0)
    pkey, xkey = jax.random.split(key)
    params = init_params(pkey, input_shape, n_actions)
    weights, cfg = prepare_params(params, input_shape, n_actions)

    x = jax.random.randint(xkey, (batch,) + input_shape, 0, 256,
                           dtype=jnp.int32).astype(jnp.uint8)

    fwd = jax.jit(functools.partial(atari_a2c_forward, cfg=cfg))
    policy, value = fwd(weights, x)
    jax.block_until_ready((policy, value))

    assert policy.shape == (batch, n_actions), policy.shape
    assert value.shape == (batch, 1), value.shape
    print("KERNEL_OK")
</pallas_src>

<mosaic_0001>
module attributes {stable_mosaic.version = 11 : i64} {
  func.func @_matmul_bias_single_k_kernel(%arg0: i32, %arg1: i32, %arg2: i32, %arg3: memref<128x256xbf16, #tpu.memory_space<vmem>>, %arg4: memref<256x128xbf16, #tpu.memory_space<vmem>>, %arg5: memref<1x128xf32, #tpu.memory_space<vmem>>, %arg6: memref<128x128xbf16, #tpu.memory_space<vmem>>) attributes {dimension_semantics = [#tpu.dimension_semantics<parallel>, #tpu.dimension_semantics<parallel>, #tpu.dimension_semantics<arbitrary>], iteration_bounds = array<i64: 1, 1, 1>, scalar_prefetch = 0 : i64, scratch_operands = 0 : i64, tpu.core_type = #tpu.core_type<tc>, window_params = [{transform_indices = @transform_0, window_bounds = array<i64: 128, 256>}, {transform_indices = @transform_1, window_bounds = array<i64: 256, 128>}, {transform_indices = @transform_2, window_bounds = array<i64: 1, 128>}, {transform_indices = @transform_3, window_bounds = array<i64: 128, 128>}]} {
    %c0 = arith.constant 0 : index
    %c0_0 = arith.constant 0 : index
    %0 = vector.load %arg3[%c0, %c0_0] : memref<128x256xbf16, #tpu.memory_space<vmem>>, vector<128x256xbf16>
    %c0_1 = arith.constant 0 : index
    %c0_2 = arith.constant 0 : index
    %1 = vector.load %arg4[%c0_1, %c0_2] : memref<256x128xbf16, #tpu.memory_space<vmem>>, vector<256x128xbf16>
    %cst = arith.constant dense<0.000000e+00> : vector<128x128xf32>
    %2 = tpu.matmul %0, %1, %cst {dimension_numbers = #tpu.dot_dimension_numbers<[1], [0], [0], [1], [0, 0, 1, 1], [], []>} : vector<128x256xbf16>, vector<256x128xbf16>, vector<128x128xf32> -> vector<128x128xf32>
    %c0_3 = arith.constant 0 : index
    %c0_4 = arith.constant 0 : index
    %3 = vector.load %arg5[%c0_3, %c0_4] : memref<1x128xf32, #tpu.memory_space<vmem>>, vector<1x128xf32>
    %4 = vector.broadcast %3 : vector<1x128xf32> to vector<128x128xf32>
    %5 = arith.addf %2, %4 : vector<128x128xf32>
    %cst_5 = arith.constant 0.000000e+00 : f32
    %6 = vector.broadcast %cst_5 : f32 to vector<128x128xf32>
    %7 = arith.maximumf %5, %6 : vector<128x128xf32>
    %8 = arith.truncf %7 : vector<128x128xf32> to vector<128x128xbf16>
    %c0_6 = arith.constant 0 : index
    %c0_7 = arith.constant 0 : index
    %9 = vector.load %arg6[%c0_6, %c0_7] : memref<128x128xbf16, #tpu.memory_space<vmem>>, vector<128x128xbf16>
    tpu.vector_store %arg6[%c0_6, %c0_7], %8 {strides = array<i32>} : memref<128x128xbf16, #tpu.memory_space<vmem>>, vector<128x128xbf16>,
    return
  }
  func.func @transform_0(%arg0: i32, %arg1: i32, %arg2: i32) -> (i32, i32) {
    %c0_i32 = arith.constant 0 : i32
    return %arg0, %arg2 : i32, i32
  }
  func.func @transform_1(%arg0: i32, %arg1: i32, %arg2: i32) -> (i32, i32) {
    %c0_i32 = arith.constant 0 : i32
    return %arg2, %arg1 : i32, i32
  }
  func.func @transform_2(%arg0: i32, %arg1: i32, %arg2: i32) -> (i32, i32) {
    %c0_i32 = arith.constant 0 : i32
    %c0_i32_0 = arith.constant 0 : i32
    return %c0_i32, %arg1 : i32, i32
  }
  func.func @transform_3(%arg0: i32, %arg1: i32, %arg2: i32) -> (i32, i32) {
    %c0_i32 = arith.constant 0 : i32
    return %arg0, %arg1 : i32, i32
  }
}

module attributes {stable_mosaic.version = 11 : i64} {
  func.func @_matmul_bias_single_k_kernel(%arg0: i32, %arg1: i32, %arg2: i32, %arg3: memref<128x512xbf16, #tpu.memory_space<vmem>>, %arg4: memref<512x128xbf16, #tpu.memory_space<vmem>>, %arg5: memref<1x128xf32, #tpu.memory_space<vmem>>, %arg6: memref<128x128xbf16, #tpu.memory_space<vmem>>) attributes {dimension_semantics = [#tpu.dimension_semantics<parallel>, #tpu.dimension_semantics<parallel>, #tpu.dimension_semantics<arbitrary>], iteration_bounds = array<i64: 1, 1, 1>, scalar_prefetch = 0 : i64, scratch_operands = 0 : i64, tpu.core_type = #tpu.core_type<tc>, window_params = [{transform_indices = @transform_0, window_bounds = array<i64: 128, 512>}, {transform_indices = @transform_1, window_bounds = array<i64: 512, 128>}, {transform_indices = @transform_2, window_bounds = array<i64: 1, 128>}, {transform_indices = @transform_3, window_bounds = array<i64: 128, 128>}]} {
    %c0 = arith.constant 0 : index
    %c0_0 = arith.constant 0 : index
    %0 = vector.load %arg3[%c0, %c0_0] : memref<128x512xbf16, #tpu.memory_space<vmem>>, vector<128x512xbf16>
    %c0_1 = arith.constant 0 : index
    %c0_2 = arith.constant 0 : index
    %1 = vector.load %arg4[%c0_1, %c0_2] : memref<512x128xbf16, #tpu.memory_space<vmem>>, vector<512x128xbf16>
    %cst = arith.constant dense<0.000000e+00> : vector<128x128xf32>
    %2 = tpu.matmul %0, %1, %cst {dimension_numbers = #tpu.dot_dimension_numbers<[1], [0], [0], [1], [0, 0, 1, 1], [], []>} : vector<128x512xbf16>, vector<512x128xbf16>, vector<128x128xf32> -> vector<128x128xf32>
    %c0_3 = arith.constant 0 : index
    %c0_4 = arith.constant 0 : index
    %3 = vector.load %arg5[%c0_3, %c0_4] : memref<1x128xf32, #tpu.memory_space<vmem>>, vector<1x128xf32>
    %4 = vector.broadcast %3 : vector<1x128xf32> to vector<128x128xf32>
    %5 = arith.addf %2, %4 : vector<128x128xf32>
    %cst_5 = arith.constant 0.000000e+00 : f32
    %6 = vector.broadcast %cst_5 : f32 to vector<128x128xf32>
    %7 = arith.maximumf %5, %6 : vector<128x128xf32>
    %8 = arith.truncf %7 : vector<128x128xf32> to vector<128x128xbf16>
    %c0_6 = arith.constant 0 : index
    %c0_7 = arith.constant 0 : index
    %9 = vector.load %arg6[%c0_6, %c0_7] : memref<128x128xbf16, #tpu.memory_space<vmem>>, vector<128x128xbf16>
    tpu.vector_store %arg6[%c0_6, %c0_7], %8 {strides = array<i32>} : memref<128x128xbf16, #tpu.memory_space<vmem>>, vector<128x128xbf16>,
    return
  }
  func.func @transform_0(%arg0: i32, %arg1: i32, %arg2: i32) -> (i32, i32) {
    %c0_i32 = arith.constant 0 : i32
    return %arg0, %arg2 : i32, i32
  }
  func.func @transform_1(%arg0: i32, %arg1: i32, %arg2: i32) -> (i32, i32) {
    %c0_i32 = arith.constant 0 : i32
    return %arg2, %arg1 : i32, i32
  }
  func.func @transform_2(%arg0: i32, %arg1: i32, %arg2: i32) -> (i32, i32) {
    %c0_i32 = arith.constant 0 : i32
    %c0_i32_0 = arith.constant 0 : i32
    return %c0_i32, %arg1 : i32, i32
  }
  func.func @transform_3(%arg0: i32, %arg1: i32, %arg2: i32) -> (i32, i32) {
    %c0_i32 = arith.constant 0 : i32
    return %arg0, %arg1 : i32, i32
  }
}

module attributes {stable_mosaic.version = 11 : i64} {
  func.func @_fused_tail_kernel(%arg0: memref<8x576xbf16, #tpu.memory_space<vmem>>, %arg1: memref<576x64xbf16, #tpu.memory_space<vmem>>, %arg2: memref<1x64xf32, #tpu.memory_space<vmem>>, %arg3: memref<64x1024xbf16, #tpu.memory_space<vmem>>, %arg4: memref<1x1024xf32, #tpu.memory_space<vmem>>, %arg5: memref<1024x128xbf16, #tpu.memory_space<vmem>>, %arg6: memref<1x128xf32, #tpu.memory_space<vmem>>, %arg7: memref<8x128xf32, #tpu.memory_space<vmem>>) attributes {dimension_semantics = [], scalar_prefetch = 0 : i64, scratch_operands = 0 : i64, tpu.core_type = #tpu.core_type<tc>} {
    %c0 = arith.constant 0 : index
    %c0_0 = arith.constant 0 : index
    %0 = vector.load %arg0[%c0, %c0_0] : memref<8x576xbf16, #tpu.memory_space<vmem>>, vector<8x576xbf16>
    %c0_1 = arith.constant 0 : index
    %c0_2 = arith.constant 0 : index
    %1 = vector.load %arg1[%c0_1, %c0_2] : memref<576x64xbf16, #tpu.memory_space<vmem>>, vector<576x64xbf16>
    %cst = arith.constant dense<0.000000e+00> : vector<8x64xf32>
    %2 = tpu.matmul %0, %1, %cst {dimension_numbers = #tpu.dot_dimension_numbers<[1], [0], [0], [1], [0, 0, 1, 1], [], []>} : vector<8x576xbf16>, vector<576x64xbf16>, vector<8x64xf32> -> vector<8x64xf32>
    %c0_3 = arith.constant 0 : index
    %c0_4 = arith.constant 0 : index
    %3 = vector.load %arg2[%c0_3, %c0_4] : memref<1x64xf32, #tpu.memory_space<vmem>>, vector<1x64xf32>
    %4 = vector.broadcast %3 : vector<1x64xf32> to vector<8x64xf32>
    %5 = arith.addf %2, %4 : vector<8x64xf32>
    %cst_5 = arith.constant 0.000000e+00 : f32
    %6 = vector.broadcast %cst_5 : f32 to vector<8x64xf32>
    %7 = arith.maximumf %5, %6 : vector<8x64xf32>
    %8 = arith.truncf %7 : vector<8x64xf32> to vector<8x64xbf16>
    %c0_6 = arith.constant 0 : index
    %c0_7 = arith.constant 0 : index
    %9 = vector.load %arg3[%c0_6, %c0_7] : memref<64x1024xbf16, #tpu.memory_space<vmem>>, vector<64x1024xbf16>
    %cst_8 = arith.constant dense<0.000000e+00> : vector<8x1024xf32>
    %10 = tpu.matmul %8, %9, %cst_8 {dimension_numbers = #tpu.dot_dimension_numbers<[1], [0], [0], [1], [0, 0, 1, 1], [], []>} : vector<8x64xbf16>, vector<64x1024xbf16>, vector<8x1024xf32> -> vector<8x1024xf32>
    %c0_9 = arith.constant 0 : index
    %c0_10 = arith.constant 0 : index
    %11 = vector.load %arg4[%c0_9, %c0_10] : memref<1x1024xf32, #tpu.memory_space<vmem>>, vector<1x1024xf32>
    %12 = vector.broadcast %11 : vector<1x1024xf32> to vector<8x1024xf32>
    %13 = arith.addf %10, %12 : vector<8x1024xf32>
    %cst_11 = arith.constant 0.000000e+00 : f32
    %14 = vector.broadcast %cst_11 : f32 to vector<8x1024xf32>
    %15 = arith.maximumf %13, %14 : vector<8x1024xf32>
    %16 = arith.truncf %15 : vector<8x1024xf32> to vector<8x1024xbf16>
    %c0_12 = arith.constant 0 : index
    %c0_13 = arith.constant 0 : index
    %17 = vector.load %arg5[%c0_12, %c0_13] : memref<1024x128xbf16, #tpu.memory_space<vmem>>, vector<1024x128xbf16>
    %cst_14 = arith.constant dense<0.000000e+00> : vector<8x128xf32>
    %18 = tpu.matmul %16, %17, %cst_14 {dimension_numbers = #tpu.dot_dimension_numbers<[1], [0], [0], [1], [0, 0, 1, 1], [], []>} : vector<8x1024xbf16>, vector<1024x128xbf16>, vector<8x128xf32> -> vector<8x128xf32>
    %c0_15 = arith.constant 0 : index
    %c0_16 = arith.constant 0 : index
    %19 = vector.load %arg6[%c0_15, %c0_16] : memref<1x128xf32, #tpu.memory_space<vmem>>, vector<1x128xf32>
    %20 = vector.broadcast %19 : vector<1x128xf32> to vector<8x128xf32>
    %21 = arith.addf %18, %20 : vector<8x128xf32>
    %c0_17 = arith.constant 0 : index
    %c0_18 = arith.constant 0 : index
    %22 = vector.load %arg7[%c0_17, %c0_18] : memref<8x128xf32, #tpu.memory_space<vmem>>, vector<8x128xf32>
    tpu.vector_store %arg7[%c0_17, %c0_18], %21 {strides = array<i32>} : memref<8x128xf32, #tpu.memory_space<vmem>>, vector<8x128xf32>,
    return
  }
}

</mosaic_0001>

<bundles_post_ra>
// kernel: atari_a2c_forward.3
= control target key start
LH: loop header
LB: loop body
LE: loop exit
PB: predicated region body
PF: predicated region fallthrough
CT: control target
= control target key end

     0   :  { %s836_s1 = inlined_call_operand.vmem [shape: bf16[256,128], index: 1, kind: input, shape index: {}]   ;;  %s837_s0 = inlined_call_operand.vmem [shape: bf16[128,256], index: 0, kind: input, shape index: {}]   ;;  %s838_s2 = inlined_call_operand.vmem [shape: f32[1,128], index: 2, kind: input, shape index: {}]   ;;  %s839_s3 = inlined_call_operand.vmem [shape: bf16[128,128], index: 3, kind: output, shape index: {}]  }
   0x1   :  { %v635_v0 = vld [vmem:[%s836_s1 + $0x40] sm:$0xff]   ;;  %v637_v2 = vld [vmem:[%s836_s1 + $0x48] sm:$0xff]   ;;  %v639_v4 = vld [vmem:[%s836_s1 + $0x50] sm:$0xff]  }
   0x2   :  { %v636_v1 = vld [vmem:[%s836_s1] sm:$0xff]   ;;  %555 = vmatprep.subr.bf16.mxu0 %v635_v0  ;;  %619 = vmatprep.subr.bf16.mxu1 %v635_v0  ;;  %v638_v3 = vld [vmem:[%s836_s1 + $0x8] sm:$0xff]   ;;  %v640_v5 = vld [vmem:[%s836_s1 + $0x10] sm:$0xff]  }
   0x3   :  { %556 = vmatpush3.bf16.msra.mxu0 %v636_v1  ;;  %627 = vmatpush3.bf16.msra.mxu1 %v636_v1  ;;  %v641_v6 = vld [vmem:[%s836_s1 + $0x58] sm:$0xff]   ;;  %v643_v8 = vld [vmem:[%s836_s1 + $0x60] sm:$0xff]   ;;  %v645_v10 = vld [vmem:[%s836_s1 + $0x68] sm:$0xff]  }
   0x4   :  { %557 = vmatprep.subr.bf16.mxu0 %v637_v2  ;;  %620 = vmatprep.subr.bf16.mxu1 %v637_v2  ;;  %v642_v7 = vld [vmem:[%s836_s1 + $0x18] sm:$0xff]   ;;  %v644_v9 = vld [vmem:[%s836_s1 + $0x20] sm:$0xff]   ;;  %v646_v13 = vld [vmem:[%s836_s1 + $0x28] sm:$0xff]  }
   0x5   :  { %v653_v11 = vld [vmem:[%s837_s0 + $0x4] ss:$8 sps:$4 sm:$0xff]   ;;  %v647_v14 = vld [vmem:[%s836_s1 + $0x70] sm:$0xff]   ;;  %v649_v16 = vld [vmem:[%s836_s1 + $0x78] sm:$0xff]  }
   0x6   :  { %v656_v12 = vld [vmem:[%s837_s0 + $0x44] ss:$8 sps:$4 sm:$0xff]   ;;  %278 = vmatprep.mubr.bf16.mxu0 %v653_v11  ;;  %v648_v15 = vld [vmem:[%s836_s1 + $0x30] sm:$0xff]   ;;  %v650_v17 = vld [vmem:[%s836_s1 + $0x38] sm:$0xff]  }
   0x7   :  { %558 = vmatpush3.bf16.msra.mxu0 %v638_v3  ;;  %628 = vmatpush3.bf16.msra.mxu1 %v638_v3  ;;  %v651_v18 = vld [vmem:[%s837_s0] ss:$8 sps:$4 sm:$0xff]   ;;  %v657_v20 = vld [vmem:[%s837_s0 + $0x14] ss:$8 sps:$4 sm:$0xff]   ;;  %v661_v22 = vld [vmem:[%s837_s0 + $0x10] ss:$8 sps:$4 sm:$0xff]  }
   0x8   :  { %559 = vmatprep.subr.bf16.mxu0 %v639_v4  ;;  %621 = vmatprep.subr.bf16.mxu1 %v639_v4  ;;  %v654_v19 = vld [vmem:[%s837_s0 + $0x40] ss:$8 sps:$4 sm:$0xff]   ;;  %v659_v21 = vld [vmem:[%s837_s0 + $0x54] ss:$8 sps:$4 sm:$0xff]   ;;  %v662_v23 = vld [vmem:[%s837_s0 + $0x50] ss:$8 sps:$4 sm:$0xff]  }
   0x9   :  { %310 = vmatprep.mubr.bf16.mxu1 %v656_v12  ;;  %v663_v24 = vld [vmem:[%s837_s0 + $0x24] ss:$8 sps:$4 sm:$0xff]   ;;  %v667_v26 = vld [vmem:[%s837_s0 + $0x20] ss:$8 sps:$4 sm:$0xff]   ;;  %v669_v28 = vld [vmem:[%s837_s0 + $0x34] ss:$8 sps:$4 sm:$0xff]  }
   0xa   :  { %v665_v25 = vld [vmem:[%s837_s0 + $0x64] ss:$8 sps:$4 sm:$0xff]   ;;  %v668_v27 = vld [vmem:[%s837_s0 + $0x60] ss:$8 sps:$4 sm:$0xff]   ;;  %v671_v29 = vld [vmem:[%s837_s0 + $0x74] ss:$8 sps:$4 sm:$0xff]  }
   0xb   :  { %560 = vmatpush3.bf16.msra.mxu0 %v640_v5  ;;  %629 = vmatpush3.bf16.msra.mxu1 %v640_v5  ;;  %v673_v30 = vld [vmem:[%s837_s0 + $0x30] ss:$8 sps:$4 sm:$0xff]   ;;  %v794_v34 = vld [vmem:[%s838_s2] ss:$0 sm:$0xff] }
   0xc   :  { %561 = vmatprep.subr.bf16.mxu0 %v641_v6  ;;  %622 = vmatprep.subr.bf16.mxu1 %v641_v6  ;;  %v674_v31 = vld [vmem:[%s837_s0 + $0x70] ss:$8 sps:$4 sm:$0xff]  }
   0xf   :  { %562 = vmatpush3.bf16.msra.mxu0 %v642_v7  ;;  %630 = vmatpush3.bf16.msra.mxu1 %v642_v7 }
  0x10   :  { %563 = vmatprep.subr.bf16.mxu0 %v643_v8  ;;  %623 = vmatprep.subr.bf16.mxu1 %v643_v8 }
  0x13   :  { %564 = vmatpush3.bf16.msra.mxu0 %v644_v9  ;;  %631 = vmatpush3.bf16.msra.mxu1 %v644_v9 }
  0x14   :  { %565 = vmatprep.subr.bf16.mxu0 %v645_v10  ;;  %624 = vmatprep.subr.bf16.mxu1 %v645_v10 }
  0x17   :  { %566 = vmatpush3.bf16.msra.mxu0 %v646_v13  ;;  %632 = vmatpush3.bf16.msra.mxu1 %v646_v13 }
  0x18   :  { %567 = vmatprep.subr.bf16.mxu0 %v647_v14  ;;  %625 = vmatprep.subr.bf16.mxu1 %v647_v14 }
  0x1b   :  { %568 = vmatpush3.bf16.msra.mxu0 %v648_v15  ;;  %633 = vmatpush3.bf16.msra.mxu1 %v648_v15 }
  0x1c   :  { %569 = vmatprep.subr.bf16.mxu0 %v649_v16  ;;  %626 = vmatprep.subr.bf16.mxu1 %v649_v16 }
  0x1f   :  { %570 = vmatpush3.bf16.msra.mxu0 %v650_v17  ;;  %634 = vmatpush3.bf16.msra.mxu1 %v650_v17 }
  0x22   :  { %279 = vmatmul.mubr.bf16.vlgmr.msra.gmra.mrb[0].mxu0 %v651_v18  ;;  %311 = vmatmul.mubr.bf16.vlgmr.msra.gmra.mrb[0].mxu1 %v654_v19 }
  0x23   :  { %286 = vmatprep.mubr.bf16.mxu0 %v657_v20  ;;  %318 = vmatprep.mubr.bf16.mxu1 %v659_v21 }
  0x2a   :  { %287 = vmatmul.mubr.bf16.gmra.mrb[4].mxu0 %v661_v22  ;;  %319 = vmatmul.mubr.bf16.gmra.mrb[4].mxu1 %v662_v23 }
  0x2b   :  { %294 = vmatprep.mubr.bf16.mxu0 %v663_v24  ;;  %326 = vmatprep.mubr.bf16.mxu1 %v665_v25 }
  0x32   :  { %295 = vmatmul.mubr.bf16.gmra.mrb[8].mxu0 %v667_v26  ;;  %327 = vmatmul.mubr.bf16.gmra.mrb[8].mxu1 %v668_v27 }
  0x33   :  { %302 = vmatprep.mubr.bf16.mxu0 %v669_v28  ;;  %334 = vmatprep.mubr.bf16.mxu1 %v671_v29 }
  0x3a   :  { %303 = vmatmul.mubr.bf16.gmra.mrb[12].mxu0 %v673_v30  ;;  %335 = vmatmul.mubr.bf16.gmra.mrb[12].mxu1 %v674_v31 }
  0xf5   :  { %v571_v32 = vpop.f32.mrb[0].mxu0  ;;  %v595_v33 = vpop.f32.mrb[0].mxu1 }
  0xf6   :  { %v572_v35 = vpop.f32.mrb[1].mxu0  ;;  %v596_v36 = vpop.f32.mrb[1].mxu1 }
  0xf7   :  { %v573_v37 = vadd.f32 %v572_v35, %v571_v32  ;;  %v597_v38 = vadd.f32 %v596_v36, %v595_v33  ;;  %v574_v39 = vpop.f32.mrb[2].mxu0  ;;  %v598_v40 = vpop.f32.mrb[2].mxu1 }
  0xf8   :  { %v575_v41 = vpop.f32.mrb[3].mxu0  ;;  %v599_v42 = vpop.f32.mrb[3].mxu1 }
  0xf9   :  { %v281_v43 = vadd.f32 %v573_v37, %v794_v34  ;;  %v313_v44 = vadd.f32 %v597_v38, %v794_v34  ;;  %v576_v45 = vadd.f32 %v575_v41, %v574_v39  ;;  %v600_v46 = vadd.f32 %v599_v42, %v598_v40 }
  0xfb   :  { %v284_v47 = vadd.f32 %v576_v45, %v794_v34  ;;  %v316_v48 = vadd.f32 %v600_v46, %v794_v34  ;;  %v343_v49 = vmax.f32 %v281_v43, 0.0  ;;  %v351_v50 = vmax.f32 %v313_v44, 0.0 }
  0xfd   :  { %v344_v51 = vmax.f32 %v284_v47, 0.0  ;;  %v352_v52 = vmax.f32 %v316_v48, 0.0  ;;  %v577_v53 = vpop.f32.mrb[4].mxu0  ;;  %v601_v54 = vpop.f32.mrb[4].mxu1 }
  0xfe   :  { %v578_v55 = vpop.f32.mrb[5].mxu0  ;;  %v602_v56 = vpop.f32.mrb[5].mxu1 }
  0xff   :  { %v511_v57 = vpack.c.bf16 %v344_v51, %v343_v49  ;;  %v531_v58 = vpack.c.bf16 %v352_v52, %v351_v50  ;;  %v579_v59 = vadd.f32 %v578_v55, %v577_v53  ;;  %v603_v60 = vadd.f32 %v602_v56, %v601_v54  ;;  %v580_v61 = vpop.f32.mrb[6].mxu0  ;;  %v604_v62 = vpop.f32.mrb[6].mxu1 }
 0x100   :  { %v581_v63 = vpop.f32.mrb[7].mxu0  ;;  %v605_v0 = vpop.f32.mrb[7].mxu1 }
 0x101   :  { %512 = vst [vmem:[%s839_s3] sm:$0xff] %v511_v57   ;;  %551 = vst [vmem:[%s839_s3 + $0x20] sm:$0xff] %v531_v58   ;;  %v289_v1 = vadd.f32 %v579_v59, %v794_v34  ;;  %v321_v2 = vadd.f32 %v603_v60, %v794_v34  ;;  %v582_v3 = vadd.f32 %v581_v63, %v580_v61 }
 0x102   :  { %v606_v4 = vadd.f32 %v605_v0, %v604_v62 }
 0x103   :  { %v292_v5 = vadd.f32 %v582_v3, %v794_v34  ;;  %v345_v7 = vmax.f32 %v289_v1, 0.0  ;;  %v353_v8 = vmax.f32 %v321_v2, 0.0 }
 0x104   :  { %v324_v6 = vadd.f32 %v606_v4, %v794_v34 }
 0x105   :  { %v346_v9 = vmax.f32 %v292_v5, 0.0  ;;  %v583_v11 = vpop.f32.mrb[8].mxu0  ;;  %v607_v12 = vpop.f32.mrb[8].mxu1 }
 0x106   :  { %v354_v10 = vmax.f32 %v324_v6, 0.0  ;;  %v584_v13 = vpop.f32.mrb[9].mxu0  ;;  %v608_v14 = vpop.f32.mrb[9].mxu1 }
 0x107   :  { %v516_v15 = vpack.c.bf16 %v346_v9, %v345_v7  ;;  %v585_v17 = vadd.f32 %v584_v13, %v583_v11  ;;  %v609_v18 = vadd.f32 %v608_v14, %v607_v12  ;;  %v586_v19 = vpop.f32.mrb[10].mxu0  ;;  %v610_v20 = vpop.f32.mrb[10].mxu1 }
 0x108   :  { %v536_v16 = vpack.c.bf16 %v354_v10, %v353_v8  ;;  %v587_v21 = vpop.f32.mrb[11].mxu0  ;;  %v611_v22 = vpop.f32.mrb[11].mxu1 }
 0x109   :  { %548 = vst [vmem:[%s839_s3 + $0x8] sm:$0xff] %v516_v15   ;;  %v297_v23 = vadd.f32 %v585_v17, %v794_v34  ;;  %v329_v24 = vadd.f32 %v609_v18, %v794_v34  ;;  %v588_v25 = vadd.f32 %v587_v21, %v586_v19  ;;  %v612_v26 = vadd.f32 %v611_v22, %v610_v20 }
 0x10a   :  { %552 = vst [vmem:[%s839_s3 + $0x28] sm:$0xff] %v536_v16  }
 0x10b   :  { %v300_v27 = vadd.f32 %v588_v25, %v794_v34  ;;  %v332_v28 = vadd.f32 %v612_v26, %v794_v34  ;;  %v347_v29 = vmax.f32 %v297_v23, 0.0  ;;  %v355_v30 = vmax.f32 %v329_v24, 0.0 }
 0x10d   :  { %v348_v31 = vmax.f32 %v300_v27, 0.0  ;;  %v356_v32 = vmax.f32 %v332_v28, 0.0  ;;  %v589_v33 = vpop.f32.mrb[12].mxu0  ;;  %v613_v35 = vpop.f32.mrb[12].mxu1 }
 0x10e   :  { %v590_v36 = vpop.f32.mrb[13].mxu0  ;;  %v614_v37 = vpop.f32.mrb[13].mxu1 }
 0x10f   :  { %v521_v38 = vpack.c.bf16 %v348_v31, %v347_v29  ;;  %v541_v39 = vpack.c.bf16 %v356_v32, %v355_v30  ;;  %v591_v40 = vadd.f32 %v590_v36, %v589_v33  ;;  %v615_v41 = vadd.f32 %v614_v37, %v613_v35  ;;  %v592_v42 = vpop.f32.mrb[14].mxu0  ;;  %v616_v43 = vpop.f32.mrb[14].mxu1 }
 0x110   :  { %v593_v44 = vpop.f32.mrb[15].mxu0  ;;  %v617_v45 = vpop.f32.mrb[15].mxu1 }
 0x111   :  { %549 = vst [vmem:[%s839_s3 + $0x10] sm:$0xff] %v521_v38   ;;  %553 = vst [vmem:[%s839_s3 + $0x30] sm:$0xff] %v541_v39   ;;  %v305_v46 = vadd.f32 %v591_v40, %v794_v34  ;;  %v337_v47 = vadd.f32 %v615_v41, %v794_v34  ;;  %v594_v48 = vadd.f32 %v593_v44, %v592_v42 }
 0x112   :  { %v618_v49 = vadd.f32 %v617_v45, %v616_v43 }
 0x113   :  { %v308_v50 = vadd.f32 %v594_v48, %v794_v34  ;;  %v349_v52 = vmax.f32 %v305_v46, 0.0  ;;  %v357_v53 = vmax.f32 %v337_v47, 0.0 }
 0x114   :  { %v340_v51 = vadd.f32 %v618_v49, %v794_v34 }
 0x115   :  { %v350_v54 = vmax.f32 %v308_v50, 0.0 }
 0x116   :  { %v358_v55 = vmax.f32 %v340_v51, 0.0 }
 0x117   :  { %v526_v56 = vpack.c.bf16 %v350_v54, %v349_v52 }
 0x118   :  { %v546_v57 = vpack.c.bf16 %v358_v55, %v357_v53 }
 0x119   :  { %550 = vst [vmem:[%s839_s3 + $0x18] sm:$0xff] %v526_v56  }
 0x11a   :  { %554 = vst [vmem:[%s839_s3 + $0x38] sm:$0xff] %v546_v57  }

// kernel: atari_a2c_forward.4
= control target key start
LH: loop header
LB: loop body
LE: loop exit
PB: predicated region body
PF: predicated region fallthrough
CT: control target
= control target key end

     0   :  { %s1373_s1 = inlined_call_operand.vmem [shape: bf16[512,128], index: 1, kind: input, shape index: {}]   ;;  %s1374_s0 = inlined_call_operand.vmem [shape: bf16[128,512], index: 0, kind: input, shape index: {}]   ;;  %s1375_s2 = inlined_call_operand.vmem [shape: f32[1,128], index: 2, kind: input, shape index: {}]   ;;  %s1376_s3 = inlined_call_operand.vmem [shape: bf16[128,128], index: 3, kind: output, shape index: {}]  }
   0x1   :  { %v1036_v0 = vld [vmem:[%s1373_s1 + $0x40] sm:$0xff]   ;;  %v1040_v4 = vld [vmem:[%s1373_s1 + $0x48] sm:$0xff]   ;;  %v1044_v8 = vld [vmem:[%s1373_s1 + $0x50] sm:$0xff]  }
   0x2   :  { %v1037_v1 = vld [vmem:[%s1373_s1 + $0xc0] sm:$0xff]   ;;  %908 = vmatprep.subr.bf16.mxu0 %v1036_v0  ;;  %v1041_v5 = vld [vmem:[%s1373_s1 + $0xc8] sm:$0xff]   ;;  %v1045_v9 = vld [vmem:[%s1373_s1 + $0xd0] sm:$0xff]  }
   0x3   :  { %v1038_v2 = vld [vmem:[%s1373_s1] sm:$0xff]   ;;  %972 = vmatprep.subr.bf16.mxu1 %v1037_v1  ;;  %v1042_v6 = vld [vmem:[%s1373_s1 + $0x8] sm:$0xff]   ;;  %v1046_v10 = vld [vmem:[%s1373_s1 + $0x10] sm:$0xff]  }
   0x4   :  { %v1039_v3 = vld [vmem:[%s1373_s1 + $0x80] sm:$0xff]   ;;  %909 = vmatpush3.bf16.msra.mxu0 %v1038_v2  ;;  %v1043_v7 = vld [vmem:[%s1373_s1 + $0x88] sm:$0xff]   ;;  %v1047_v11 = vld [vmem:[%s1373_s1 + $0x90] sm:$0xff]  }
   0x5   :  { %973 = vmatpush3.bf16.msra.mxu1 %v1039_v3  ;;  %910 = vmatprep.subr.bf16.mxu0 %v1040_v4  ;;  %v1048_v12 = vld [vmem:[%s1373_s1 + $0x58] sm:$0xff]   ;;  %v1052_v16 = vld [vmem:[%s1373_s1 + $0x60] sm:$0xff]   ;;  %v1056_v20 = vld [vmem:[%s1373_s1 + $0x68] sm:$0xff]  }
   0x6   :  { %974 = vmatprep.subr.bf16.mxu1 %v1041_v5  ;;  %v1049_v13 = vld [vmem:[%s1373_s1 + $0xd8] sm:$0xff]   ;;  %v1053_v17 = vld [vmem:[%s1373_s1 + $0xe0] sm:$0xff]   ;;  %v1057_v21 = vld [vmem:[%s1373_s1 + $0xe8] sm:$0xff]  }
   0x7   :  { %v1050_v14 = vld [vmem:[%s1373_s1 + $0x18] sm:$0xff]   ;;  %v1054_v18 = vld [vmem:[%s1373_s1 + $0x20] sm:$0xff]   ;;  %v1058_v22 = vld [vmem:[%s1373_s1 + $0x28] sm:$0xff]  }
   0x8   :  { %911 = vmatpush3.bf16.msra.mxu0 %v1042_v6  ;;  %v1051_v15 = vld [vmem:[%s1373_s1 + $0x98] sm:$0xff]   ;;  %v1055_v19 = vld [vmem:[%s1373_s1 + $0xa0] sm:$0xff]   ;;  %v1059_v23 = vld [vmem:[%s1373_s1 + $0xa8] sm:$0xff]  }
   0x9   :  { %975 = vmatpush3.bf16.msra.mxu1 %v1043_v7  ;;  %912 = vmatprep.subr.bf16.mxu0 %v1044_v8  ;;  %v1060_v24 = vld [vmem:[%s1373_s1 + $0x70] sm:$0xff]   ;;  %v1064_v28 = vld [vmem:[%s1373_s1 + $0x78] sm:$0xff]   ;;  %v1331_v2 = vld [vmem:[%s1375_s2] ss:$0 sm:$0xff] }
   0xa   :  { %976 = vmatprep.subr.bf16.mxu1 %v1045_v9  ;;  %v1061_v25 = vld [vmem:[%s1373_s1 + $0xf0] sm:$0xff]   ;;  %v1065_v29 = vld [vmem:[%s1373_s1 + $0xf8] sm:$0xff]  }
   0xb   :  { %v1062_v26 = vld [vmem:[%s1373_s1 + $0x30] sm:$0xff]   ;;  %v1066_v30 = vld [vmem:[%s1373_s1 + $0x38] sm:$0xff]  }
   0xc   :  { %913 = vmatpush3.bf16.msra.mxu0 %v1046_v10  ;;  %v1063_v27 = vld [vmem:[%s1373_s1 + $0xb0] sm:$0xff]   ;;  %v1067_v31 = vld [vmem:[%s1373_s1 + $0xb8] sm:$0xff]  }
   0xd   :  { %977 = vmatpush3.bf16.msra.mxu1 %v1047_v11  ;;  %914 = vmatprep.subr.bf16.mxu0 %v1048_v12  ;;  %v1068_v32 = vld [vmem:[%s1374_s0] ss:$16 sps:$4 sm:$0xff]   ;;  %v1070_v33 = vld [vmem:[%s1374_s0 + $0x4] ss:$16 sps:$4 sm:$0xff]   ;;  %v1071_v34 = vld [vmem:[%s1374_s0 + $0x8] ss:$16 sps:$4 sm:$0xff]  }
   0xe   :  { %978 = vmatprep.subr.bf16.mxu1 %v1049_v13  ;;  %v1073_v35 = vld [vmem:[%s1374_s0 + $0xc] ss:$16 sps:$4 sm:$0xff]   ;;  %502 = vmatprep.mubr.bf16.mxu0 %v1070_v33  ;;  %v1074_v36 = vld [vmem:[%s1374_s0 + $0x24] ss:$16 sps:$4 sm:$0xff]   ;;  %v1078_v38 = vld [vmem:[%s1374_s0 + $0x20] ss:$16 sps:$4 sm:$0xff]  }
   0xf   :  { %599 = vmatprep.mubr.bf16.mxu1 %v1073_v35  ;;  %v1076_v37 = vld [vmem:[%s1374_s0 + $0x2c] ss:$16 sps:$4 sm:$0xff]   ;;  %v1079_v39 = vld [vmem:[%s1374_s0 + $0x28] ss:$16 sps:$4 sm:$0xff]   ;;  %v1080_v40 = vld [vmem:[%s1374_s0 + $0x44] ss:$16 sps:$4 sm:$0xff]  }
  0x10   :  { %915 = vmatpush3.bf16.msra.mxu0 %v1050_v14  ;;  %v1082_v41 = vld [vmem:[%s1374_s0 + $0x4c] ss:$16 sps:$4 sm:$0xff]   ;;  %v1084_v42 = vld [vmem:[%s1374_s0 + $0x40] ss:$16 sps:$4 sm:$0xff]   ;;  %v1085_v43 = vld [vmem:[%s1374_s0 + $0x48] ss:$16 sps:$4 sm:$0xff]  }
  0x11   :  { %979 = vmatpush3.bf16.msra.mxu1 %v1051_v15  ;;  %916 = vmatprep.subr.bf16.mxu0 %v1052_v16  ;;  %v1086_v44 = vld [vmem:[%s1374_s0 + $0x64] ss:$16 sps:$4 sm:$0xff]   ;;  %v1088_v45 = vld [vmem:[%s1374_s0 + $0x6c] ss:$16 sps:$4 sm:$0xff]   ;;  %v1090_v46 = vld [vmem:[%s1374_s0 + $0x60] ss:$16 sps:$4 sm:$0xff]  }
  0x12   :  { %980 = vmatprep.subr.bf16.mxu1 %v1053_v17  ;;  %v1091_v47 = vld [vmem:[%s1374_s0 + $0x68] ss:$16 sps:$4 sm:$0xff]   ;;  %v1092_v48 = vld [vmem:[%s1374_s0 + $0x84] ss:$16 sps:$4 sm:$0xff]   ;;  %v1094_v49 = vld [vmem:[%s1374_s0 + $0x8c] ss:$16 sps:$4 sm:$0xff]  }
  0x13   :  { %v1096_v50 = vld [vmem:[%s1374_s0 + $0x80] ss:$16 sps:$4 sm:$0xff]   ;;  %v1097_v51 = vld [vmem:[%s1374_s0 + $0x88] ss:$16 sps:$4 sm:$0xff]   ;;  %v1098_v52 = vld [vmem:[%s1374_s0 + $0xa4] ss:$16 sps:$4 sm:$0xff]  }
  0x14   :  { %917 = vmatpush3.bf16.msra.mxu0 %v1054_v18  ;;  %v1100_v53 = vld [vmem:[%s1374_s0 + $0xac] ss:$16 sps:$4 sm:$0xff]   ;;  %v1102_v54 = vld [vmem:[%s1374_s0 + $0xa0] ss:$16 sps:$4 sm:$0xff]   ;;  %v1103_v55 = vld [vmem:[%s1374_s0 + $0xa8] ss:$16 sps:$4 sm:$0xff]  }
  0x15   :  { %981 = vmatpush3.bf16.msra.mxu1 %v1055_v19  ;;  %918 = vmatprep.subr.bf16.mxu0 %v1056_v20  ;;  %v1104_v56 = vld [vmem:[%s1374_s0 + $0xc4] ss:$16 sps:$4 sm:$0xff]   ;;  %v1106_v57 = vld [vmem:[%s1374_s0 + $0xcc] ss:$16 sps:$4 sm:$0xff]   ;;  %v1108_v58 = vld [vmem:[%s1374_s0 + $0xc0] ss:$16 sps:$4 sm:$0xff]  }
  0x16   :  { %982 = vmatprep.subr.bf16.mxu1 %v1057_v21  ;;  %v1109_v59 = vld [vmem:[%s1374_s0 + $0xc8] ss:$16 sps:$4 sm:$0xff]   ;;  %v1110_v60 = vld [vmem:[%s1374_s0 + $0xe4] ss:$16 sps:$4 sm:$0xff]   ;;  %v1112_v61 = vld [vmem:[%s1374_s0 + $0xec] ss:$16 sps:$4 sm:$0xff]  }
  0x17   :  { %v1114_v62 = vld [vmem:[%s1374_s0 + $0xe0] ss:$16 sps:$4 sm:$0xff]   ;;  %v1115_v63 = vld [vmem:[%s1374_s0 + $0xe8] ss:$16 sps:$4 sm:$0xff]  }
  0x18   :  { %919 = vmatpush3.bf16.msra.mxu0 %v1058_v22 }
  0x19   :  { %983 = vmatpush3.bf16.msra.mxu1 %v1059_v23  ;;  %920 = vmatprep.subr.bf16.mxu0 %v1060_v24 }
  0x1a   :  { %984 = vmatprep.subr.bf16.mxu1 %v1061_v25 }
  0x1c   :  { %921 = vmatpush3.bf16.msra.mxu0 %v1062_v26 }
  0x1d   :  { %985 = vmatpush3.bf16.msra.mxu1 %v1063_v27  ;;  %922 = vmatprep.subr.bf16.mxu0 %v1064_v28 }
  0x1e   :  { %986 = vmatprep.subr.bf16.mxu1 %v1065_v29 }
  0x20   :  { %923 = vmatpush3.bf16.msra.mxu0 %v1066_v30 }
  0x21   :  { %987 = vmatpush3.bf16.msra.mxu1 %v1067_v31 }
  0x23   :  { %503 = vmatmul.mubr.bf16.vlgmr.msra.gmra.mrb[0].mxu0 %v1068_v32 }
  0x24   :  { %600 = vmatmul.mubr.bf16.vlgmr.msra.gmra.mrb[0].mxu1 %v1071_v34  ;;  %510 = vmatprep.mubr.bf16.mxu0 %v1074_v36 }
  0x25   :  { %607 = vmatprep.mubr.bf16.mxu1 %v1076_v37 }
  0x2b   :  { %511 = vmatmul.mubr.bf16.gmra.mrb[4].mxu0 %v1078_v38 }
  0x2c   :  { %608 = vmatmul.mubr.bf16.gmra.mrb[4].mxu1 %v1079_v39  ;;  %518 = vmatprep.mubr.bf16.mxu0 %v1080_v40 }
  0x2d   :  { %615 = vmatprep.mubr.bf16.mxu1 %v1082_v41 }
  0x33   :  { %519 = vmatmul.mubr.bf16.gmra.mrb[8].mxu0 %v1084_v42 }
  0x34   :  { %616 = vmatmul.mubr.bf16.gmra.mrb[8].mxu1 %v1085_v43  ;;  %526 = vmatprep.mubr.bf16.mxu0 %v1086_v44 }
  0x35   :  { %623 = vmatprep.mubr.bf16.mxu1 %v1088_v45 }
  0x3b   :  { %527 = vmatmul.mubr.bf16.gmra.mrb[12].mxu0 %v1090_v46 }
  0x3c   :  { %624 = vmatmul.mubr.bf16.gmra.mrb[12].mxu1 %v1091_v47  ;;  %534 = vmatprep.mubr.bf16.mxu0 %v1092_v48 }
  0x3d   :  { %631 = vmatprep.mubr.bf16.mxu1 %v1094_v49 }
  0x43   :  { %535 = vmatmul.mubr.bf16.gmra.mrb[16].mxu0 %v1096_v50 }
  0x44   :  { %632 = vmatmul.mubr.bf16.gmra.mrb[16].mxu1 %v1097_v51  ;;  %542 = vmatprep.mubr.bf16.mxu0 %v1098_v52 }
  0x45   :  { %639 = vmatprep.mubr.bf16.mxu1 %v1100_v53 }
  0x4b   :  { %543 = vmatmul.mubr.bf16.gmra.mrb[20].mxu0 %v1102_v54 }
  0x4c   :  { %640 = vmatmul.mubr.bf16.gmra.mrb[20].mxu1 %v1103_v55  ;;  %550 = vmatprep.mubr.bf16.mxu0 %v1104_v56 }
  0x4d   :  { %647 = vmatprep.mubr.bf16.mxu1 %v1106_v57 }
  0x53   :  { %551 = vmatmul.mubr.bf16.gmra.mrb[24].mxu0 %v1108_v58 }
  0x54   :  { %648 = vmatmul.mubr.bf16.gmra.mrb[24].mxu1 %v1109_v59  ;;  %558 = vmatprep.mubr.bf16.mxu0 %v1110_v60 }
  0x55   :  { %655 = vmatprep.mubr.bf16.mxu1 %v1112_v61 }
  0x5b   :  { %559 = vmatmul.mubr.bf16.gmra.mrb[28].mxu0 %v1114_v62 }
  0x5c   :  { %656 = vmatmul.mubr.bf16.gmra.mrb[28].mxu1 %v1115_v63 }
  0xf6   :  { %v924_v0 = vpop.f32.mrb[0].mxu0 }
  0xf7   :  { %v988_v1 = vpop.f32.mrb[0].mxu1  ;;  %v925_v3 = vpop.f32.mrb[1].mxu0 }
  0xf8   :  { %v926_v4 = vadd.f32 %v925_v3, %v924_v0  ;;  %v989_v5 = vpop.f32.mrb[1].mxu1  ;;  %v927_v6 = vpop.f32.mrb[2].mxu0 }
  0xf9   :  { %v990_v7 = vadd.f32 %v989_v5, %v988_v1  ;;  %v991_v8 = vpop.f32.mrb[2].mxu1  ;;  %v928_v9 = vpop.f32.mrb[3].mxu0 }
  0xfa   :  { %v505_v10 = vadd.f32 %v926_v4, %v1331_v2  ;;  %v929_v11 = vadd.f32 %v928_v9, %v927_v6  ;;  %v992_v12 = vpop.f32.mrb[3].mxu1 }
  0xfb   :  { %v993_v13 = vadd.f32 %v992_v12, %v991_v8 }
  0xfc   :  { %v602_v14 = vadd.f32 %v990_v7, %v505_v10  ;;  %v508_v15 = vadd.f32 %v929_v11, %v1331_v2 }
  0xfe   :  { %v605_v16 = vadd.f32 %v993_v13, %v508_v15  ;;  %v930_v17 = vpop.f32.mrb[4].mxu0  ;;  %v664_v20 = vmax.f32 %v602_v14, 0.0 }
  0xff   :  { %v994_v18 = vpop.f32.mrb[4].mxu1  ;;  %v931_v19 = vpop.f32.mrb[5].mxu0 }
 0x100   :  { %v665_v21 = vmax.f32 %v605_v16, 0.0  ;;  %v932_v22 = vadd.f32 %v931_v19, %v930_v17  ;;  %v995_v23 = vpop.f32.mrb[5].mxu1  ;;  %v933_v24 = vpop.f32.mrb[6].mxu0 }
 0x101   :  { %v996_v25 = vadd.f32 %v995_v23, %v994_v18  ;;  %v997_v26 = vpop.f32.mrb[6].mxu1  ;;  %v934_v27 = vpop.f32.mrb[7].mxu0 }
 0x102   :  { %v864_v28 = vpack.c.bf16 %v665_v21, %v664_v20  ;;  %v513_v29 = vadd.f32 %v932_v22, %v1331_v2  ;;  %v935_v30 = vadd.f32 %v934_v27, %v933_v24  ;;  %v998_v31 = vpop.f32.mrb[7].mxu1 }
 0x103   :  { %v999_v32 = vadd.f32 %v998_v31, %v997_v26 }
 0x104   :  { %865 = vst [vmem:[%s1376_s3] sm:$0xff] %v864_v28   ;;  %v610_v33 = vadd.f32 %v996_v25, %v513_v29  ;;  %v516_v34 = vadd.f32 %v935_v30, %v1331_v2 }
 0x106   :  { %v613_v35 = vadd.f32 %v999_v32, %v516_v34  ;;  %v936_v36 = vpop.f32.mrb[8].mxu0  ;;  %v666_v39 = vmax.f32 %v610_v33, 0.0 }
 0x107   :  { %v1000_v37 = vpop.f32.mrb[8].mxu1  ;;  %v937_v38 = vpop.f32.mrb[9].mxu0 }
 0x108   :  { %v667_v40 = vmax.f32 %v613_v35, 0.0  ;;  %v938_v41 = vadd.f32 %v937_v38, %v936_v36  ;;  %v1001_v42 = vpop.f32.mrb[9].mxu1  ;;  %v939_v43 = vpop.f32.mrb[10].mxu0 }
 0x109   :  { %v1002_v44 = vadd.f32 %v1001_v42, %v1000_v37  ;;  %v1003_v45 = vpop.f32.mrb[10].mxu1  ;;  %v940_v46 = vpop.f32.mrb[11].mxu0 }
 0x10a   :  { %v869_v47 = vpack.c.bf16 %v667_v40, %v666_v39  ;;  %v521_v48 = vadd.f32 %v938_v41, %v1331_v2  ;;  %v941_v49 = vadd.f32 %v940_v46, %v939_v43  ;;  %v1004_v50 = vpop.f32.mrb[11].mxu1 }
 0x10b   :  { %v1005_v51 = vadd.f32 %v1004_v50, %v1003_v45 }
 0x10c   :  { %901 = vst [vmem:[%s1376_s3 + $0x8] sm:$0xff] %v869_v47   ;;  %v618_v52 = vadd.f32 %v1002_v44, %v521_v48  ;;  %v524_v53 = vadd.f32 %v941_v49, %v1331_v2 }
 0x10e   :  { %v621_v54 = vadd.f32 %v1005_v51, %v524_v53  ;;  %v942_v55 = vpop.f32.mrb[12].mxu0  ;;  %v668_v58 = vmax.f32 %v618_v52, 0.0 }
 0x10f   :  { %v1006_v56 = vpop.f32.mrb[12].mxu1  ;;  %v943_v57 = vpop.f32.mrb[13].mxu0 }
 0x110   :  { %v669_v59 = vmax.f32 %v621_v54, 0.0  ;;  %v944_v60 = vadd.f32 %v943_v57, %v942_v55  ;;  %v1007_v61 = vpop.f32.mrb[13].mxu1  ;;  %v945_v62 = vpop.f32.mrb[14].mxu0 }
 0x111   :  { %v1008_v63 = vadd.f32 %v1007_v61, %v1006_v56  ;;  %v1009_v0 = vpop.f32.mrb[14].mxu1  ;;  %v946_v1 = vpop.f32.mrb[15].mxu0 }
 0x112   :  { %v874_v3 = vpack.c.bf16 %v669_v59, %v668_v58  ;;  %v529_v4 = vadd.f32 %v944_v60, %v1331_v2  ;;  %v947_v5 = vadd.f32 %v946_v1, %v945_v62  ;;  %v1010_v6 = vpop.f32.mrb[15].mxu1 }
 0x113   :  { %v1011_v7 = vadd.f32 %v1010_v6, %v1009_v0 }
 0x114   :  { %902 = vst [vmem:[%s1376_s3 + $0x10] sm:$0xff] %v874_v3   ;;  %v626_v8 = vadd.f32 %v1008_v63, %v529_v4  ;;  %v532_v9 = vadd.f32 %v947_v5, %v1331_v2 }
 0x116   :  { %v629_v10 = vadd.f32 %v1011_v7, %v532_v9  ;;  %v948_v11 = vpop.f32.mrb[16].mxu0  ;;  %v670_v14 = vmax.f32 %v626_v8, 0.0 }
 0x117   :  { %v1012_v12 = vpop.f32.mrb[16].mxu1  ;;  %v949_v13 = vpop.f32.mrb[17].mxu0 }
 0x118   :  { %v671_v15 = vmax.f32 %v629_v10, 0.0  ;;  %v950_v16 = vadd.f32 %v949_v13, %v948_v11  ;;  %v1013_v17 = vpop.f32.mrb[17].mxu1  ;;  %v951_v18 = vpop.f32.mrb[18].mxu0 }
 0x119   :  { %v1014_v19 = vadd.f32 %v1013_v17, %v1012_v12  ;;  %v1015_v20 = vpop.f32.mrb[18].mxu1  ;;  %v952_v21 = vpop.f32.mrb[19].mxu0 }
 0x11a   :  { %v879_v22 = vpack.c.bf16 %v671_v15, %v670_v14  ;;  %v537_v23 = vadd.f32 %v950_v16, %v1331_v2  ;;  %v953_v24 = vadd.f32 %v952_v21, %v951_v18  ;;  %v1016_v25 = vpop.f32.mrb[19].mxu1 }
 0x11b   :  { %v1017_v26 = vadd.f32 %v1016_v25, %v1015_v20 }
 0x11c   :  { %903 = vst [vmem:[%s1376_s3 + $0x18] sm:$0xff] %v879_v22   ;;  %v634_v27 = vadd.f32 %v1014_v19, %v537_v23  ;;  %v540_v28 = vadd.f32 %v953_v24, %v1331_v2 }
 0x11e   :  { %v637_v29 = vadd.f32 %v1017_v26, %v540_v28  ;;  %v954_v30 = vpop.f32.mrb[20].mxu0  ;;  %v672_v33 = vmax.f32 %v634_v27, 0.0 }
 0x11f   :  { %v1018_v31 = vpop.f32.mrb[20].mxu1  ;;  %v955_v32 = vpop.f32.mrb[21].mxu0 }
 0x120   :  { %v673_v34 = vmax.f32 %v637_v29, 0.0  ;;  %v956_v35 = vadd.f32 %v955_v32, %v954_v30  ;;  %v1019_v36 = vpop.f32.mrb[21].mxu1  ;;  %v957_v37 = vpop.f32.mrb[22].mxu0 }
 0x121   :  { %v1020_v38 = vadd.f32 %v1019_v36, %v1018_v31  ;;  %v1021_v39 = vpop.f32.mrb[22].mxu1  ;;  %v958_v40 = vpop.f32.mrb[23].mxu0 }
 0x122   :  { %v884_v41 = vpack.c.bf16 %v673_v34, %v672_v33  ;;  %v545_v42 = vadd.f32 %v956_v35, %v1331_v2  ;;  %v959_v43 = vadd.f32 %v958_v40, %v957_v37  ;;  %v1022_v44 = vpop.f32.mrb[23].mxu1 }
 0x123   :  { %v1023_v45 = vadd.f32 %v1022_v44, %v1021_v39 }
 0x124   :  { %904 = vst [vmem:[%s1376_s3 + $0x20] sm:$0xff] %v884_v41   ;;  %v642_v46 = vadd.f32 %v1020_v38, %v545_v42  ;;  %v548_v47 = vadd.f32 %v959_v43, %v1331_v2 }
 0x126   :  { %v645_v48 = vadd.f32 %v1023_v45, %v548_v47  ;;  %v960_v49 = vpop.f32.mrb[24].mxu0  ;;  %v674_v52 = vmax.f32 %v642_v46, 0.0 }
 0x127   :  { %v1024_v50 = vpop.f32.mrb[24].mxu1  ;;  %v961_v51 = vpop.f32.mrb[25].mxu0 }
 0x128   :  { %v675_v53 = vmax.f32 %v645_v48, 0.0  ;;  %v962_v54 = vadd.f32 %v961_v51, %v960_v49  ;;  %v1025_v55 = vpop.f32.mrb[25].mxu1  ;;  %v963_v56 = vpop.f32.mrb[26].mxu0 }
 0x129   :  { %v1026_v57 = vadd.f32 %v1025_v55, %v1024_v50  ;;  %v1027_v58 = vpop.f32.mrb[26].mxu1  ;;  %v964_v59 = vpop.f32.mrb[27].mxu0 }
 0x12a   :  { %v889_v60 = vpack.c.bf16 %v675_v53, %v674_v52  ;;  %v553_v61 = vadd.f32 %v962_v54, %v1331_v2  ;;  %v965_v62 = vadd.f32 %v964_v59, %v963_v56  ;;  %v1028_v63 = vpop.f32.mrb[27].mxu1 }
 0x12b   :  { %v1029_v0 = vadd.f32 %v1028_v63, %v1027_v58 }
 0x12c   :  { %905 = vst [vmem:[%s1376_s3 + $0x28] sm:$0xff] %v889_v60   ;;  %v650_v1 = vadd.f32 %v1026_v57, %v553_v61  ;;  %v556_v3 = vadd.f32 %v965_v62, %v1331_v2 }
 0x12e   :  { %v653_v4 = vadd.f32 %v1029_v0, %v556_v3  ;;  %v966_v5 = vpop.f32.mrb[28].mxu0  ;;  %v676_v8 = vmax.f32 %v650_v1, 0.0 }
 0x12f   :  { %v1030_v6 = vpop.f32.mrb[28].mxu1  ;;  %v967_v7 = vpop.f32.mrb[29].mxu0 }
 0x130   :  { %v677_v9 = vmax.f32 %v653_v4, 0.0  ;;  %v968_v10 = vadd.f32 %v967_v7, %v966_v5  ;;  %v1031_v11 = vpop.f32.mrb[29].mxu1  ;;  %v969_v12 = vpop.f32.mrb[30].mxu0 }
 0x131   :  { %v1032_v13 = vadd.f32 %v1031_v11, %v1030_v6  ;;  %v1033_v14 = vpop.f32.mrb[30].mxu1  ;;  %v970_v15 = vpop.f32.mrb[31].mxu0 }
 0x132   :  { %v894_v16 = vpack.c.bf16 %v677_v9, %v676_v8  ;;  %v561_v17 = vadd.f32 %v968_v10, %v1331_v2  ;;  %v971_v18 = vadd.f32 %v970_v15, %v969_v12  ;;  %v1034_v19 = vpop.f32.mrb[31].mxu1 }
 0x133   :  { %v1035_v20 = vadd.f32 %v1034_v19, %v1033_v14 }
 0x134   :  { %906 = vst [vmem:[%s1376_s3 + $0x30] sm:$0xff] %v894_v16   ;;  %v658_v21 = vadd.f32 %v1032_v13, %v561_v17  ;;  %v564_v22 = vadd.f32 %v971_v18, %v1331_v2 }
 0x136   :  { %v661_v23 = vadd.f32 %v1035_v20, %v564_v22  ;;  %v678_v24 = vmax.f32 %v658_v21, 0.0 }
 0x138   :  { %v679_v25 = vmax.f32 %v661_v23, 0.0 }
 0x13a   :  { %v899_v26 = vpack.c.bf16 %v679_v25, %v678_v24 }
 0x13c   :  { %907 = vst [vmem:[%s1376_s3 + $0x38] sm:$0xff] %v899_v26  }

// kernel: atari_a2c_forward.5
= control target key start
LH: loop header
LB: loop body
LE: loop exit
PB: predicated region body
PF: predicated region fallthrough
CT: control target
= control target key end

     0   :  { %v1970_v35 = vmov 0.0   ;;  %vm1971_vm0 = vmmov 0   ;;  %vm342_vm1 = vcmask 523264   ;;  %s2455_s1 = inlined_call_operand.vmem [shape: bf16[576,64], index: 1, kind: input, shape index: {}]   ;;  %s2456_s0 = inlined_call_operand.vmem [shape: bf16[8,576], index: 0, kind: input, shape index: {}]   ;;  %s2457_s3 = inlined_call_operand.vmem [shape: bf16[64,1024], index: 3, kind: input, shape index: {}]   ;;  %s2458_s5 = inlined_call_operand.vmem [shape: bf16[1024,128], index: 5, kind: input, shape index: {}]   ;;  %s2459_s2 = inlined_call_operand.vmem [shape: f32[1,64], index: 2, kind: input, shape index: {}]   ;;  %s2460_s4 = inlined_call_operand.vmem [shape: f32[1,1024], index: 4, kind: input, shape index: {}]   ;;  %s2461_s6 = inlined_call_operand.vmem [shape: f32[1,128], index: 6, kind: input, shape index: {}]   ;;  %s2462_s7 = inlined_call_operand.vmem [shape: f32[8,128], index: 7, kind: output, shape index: {}]  }
   0x1   :  { %v1865_v0 = vld [vmem:[%s2455_s1 + $0x40] sm:$0xff]   ;;  %v1869_v4 = vld [vmem:[%s2455_s1 + $0x48] sm:$0xff]   ;;  %v1873_v8 = vld [vmem:[%s2455_s1 + $0x50] sm:$0xff]  }
   0x2   :  { %v1866_v1 = vld [vmem:[%s2455_s1] sm:$0xff]   ;;  %1713 = vmatprep.subr.bf16.mxu0 %v1865_v0  ;;  %v1870_v5 = vld [vmem:[%s2455_s1 + $0x8] sm:$0xff]   ;;  %v1874_v9 = vld [vmem:[%s2455_s1 + $0x10] sm:$0xff]  }
   0x3   :  { %v1867_v2 = vld [vmem:[%s2455_s1 + $0xc0] sm:$0xff]   ;;  %1714 = vmatpush3.bf16.msra.mxu0 %v1866_v1  ;;  %v1871_v6 = vld [vmem:[%s2455_s1 + $0xc8] sm:$0xff]   ;;  %v1875_v10 = vld [vmem:[%s2455_s1 + $0xd0] sm:$0xff]  }
   0x4   :  { %v1868_v3 = vld [vmem:[%s2455_s1 + $0x80] sm:$0xff]   ;;  %1735 = vmatprep.subr.bf16.mxu1 %v1867_v2  ;;  %1715 = vmatprep.subr.bf16.mxu0 %v1869_v4  ;;  %v1872_v7 = vld [vmem:[%s2455_s1 + $0x88] sm:$0xff]   ;;  %v1876_v11 = vld [vmem:[%s2455_s1 + $0x90] sm:$0xff]  }
   0x5   :  { %1736 = vmatpush3.bf16.msra.mxu1 %v1868_v3  ;;  %v1877_v12 = vld [vmem:[%s2455_s1 + $0x58] sm:$0xff]   ;;  %v1881_v16 = vld [vmem:[%s2455_s1 + $0x60] sm:$0xff]   ;;  %v1885_v20 = vld [vmem:[%s2455_s1 + $0x68] sm:$0xff]  }
   0x6   :  { %1737 = vmatprep.subr.bf16.mxu1 %v1871_v6  ;;  %v1878_v13 = vld [vmem:[%s2455_s1 + $0x18] sm:$0xff]   ;;  %v1882_v17 = vld [vmem:[%s2455_s1 + $0x20] sm:$0xff]   ;;  %v1886_v21 = vld [vmem:[%s2455_s1 + $0x28] sm:$0xff]  }
   0x7   :  { %1716 = vmatpush3.bf16.msra.mxu0 %v1870_v5  ;;  %v1879_v14 = vld [vmem:[%s2455_s1 + $0xd8] sm:$0xff]   ;;  %v1883_v18 = vld [vmem:[%s2455_s1 + $0xe0] sm:$0xff]   ;;  %v1887_v22 = vld [vmem:[%s2455_s1 + $0xe8] sm:$0xff]  }
   0x8   :  { %1717 = vmatprep.subr.bf16.mxu0 %v1873_v8  ;;  %v1880_v15 = vld [vmem:[%s2455_s1 + $0x98] sm:$0xff]   ;;  %v1884_v19 = vld [vmem:[%s2455_s1 + $0xa0] sm:$0xff]   ;;  %v1888_v23 = vld [vmem:[%s2455_s1 + $0xa8] sm:$0xff]  }
   0x9   :  { %1738 = vmatpush3.bf16.msra.mxu1 %v1872_v7  ;;  %v1889_v24 = vld [vmem:[%s2455_s1 + $0x70] sm:$0xff]   ;;  %v1893_v28 = vld [vmem:[%s2455_s1 + $0x78] sm:$0xff]   ;;  %v27_v31 = vld [vmem:[%s2456_s0] sm:$0xff] }
   0xa   :  { %1739 = vmatprep.subr.bf16.mxu1 %v1875_v10  ;;  %v1890_v25 = vld [vmem:[%s2455_s1 + $0x30] sm:$0xff]   ;;  %v1894_v29 = vld [vmem:[%s2455_s1 + $0x38] sm:$0xff]   ;;  %v1570_v32 = vcombine.low %v27_v31, %v27_v31  ;;  %v1571_v33 = vcombine.high %v27_v31, %v27_v31  ;;  %v28_v36 = vld [vmem:[%s2456_s0 + $0x8] sm:$0xff] }
   0xb   :  { %1718 = vmatpush3.bf16.msra.mxu0 %v1874_v9  ;;  %v1891_v26 = vld [vmem:[%s2455_s1 + $0xf0] sm:$0xff]   ;;  %v1895_v30 = vld [vmem:[%s2455_s1 + $0xf8] sm:$0xff]   ;;  %v1572_v37 = vcombine.low %v28_v36, %v28_v36  ;;  %v1573_v38 = vcombine.high %v28_v36, %v28_v36  ;;  %v1902_v39 = vld [vmem:[%s2455_s1 + $0x100] sm:$0xff]  }
   0xc   :  { %1719 = vmatprep.subr.bf16.mxu0 %v1877_v12  ;;  %v1892_v27 = vld [vmem:[%s2455_s1 + $0xb0] sm:$0xff]   ;;  %v1899_v34 = vld [vmem:[%s2455_s1 + $0xb8] sm:$0xff]   ;;  %378 = vmatprep.mubr.bf16.mxu0 %v1571_v33  ;;  %v1903_v40 = vld [vmem:[%s2455_s1 + $0x108] sm:$0xff]  }
   0xd   :  { %1740 = vmatpush3.bf16.msra.mxu1 %v1876_v11  ;;  %418 = vmatprep.mubr.bf16.mxu1 %v1573_v38  ;;  %v1904_v41 = vld [vmem:[%s2455_s1 + $0x110] sm:$0xff]   ;;  %v1905_v42 = vld [vmem:[%s2455_s1 + $0x118] sm:$0xff]   ;;  %v468_v44 = vld [vmem:[%s2457_s3] sm:$0xff] }
   0xe   :  { %1741 = vmatprep.subr.bf16.mxu1 %v1879_v14  ;;  %v1898_v43 = vld [vmem:[%s2456_s0 + $0x10] ss:$0 sps:$4 sm:$0xff]   ;;  %v472_v45 = vld [vmem:[%s2457_s3 + $0x20] sm:$0xff]  ;;  %v469_v46 = vld [vmem:[%s2457_s3 + $0x8] sm:$0xff] }
   0xf   :  { %1720 = vmatpush3.bf16.msra.mxu0 %v1878_v13  ;;  %v1612_v47 = vcombine.low %v468_v44, %v472_v45  ;;  %v1613_v48 = vcombine.high %v468_v44, %v472_v45  ;;  %v473_v49 = vld [vmem:[%s2457_s3 + $0x28] sm:$0xff]  ;;  %v476_v50 = vld [vmem:[%s2457_s3 + $0x40] sm:$0xff]  ;;  %v470_v12 = vld [vmem:[%s2457_s3 + $0x10] sm:$0xff] }
  0x10   :  { %1721 = vmatprep.subr.bf16.mxu0 %v1881_v16  ;;  %v480_v51 = vld [vmem:[%s2457_s3 + $0x60] sm:$0xff]  ;;  %v1614_v52 = vcombine.low %v469_v46, %v473_v49  ;;  %v1615_v53 = vcombine.high %v469_v46, %v473_v49  ;;  %v477_v55 = vld [vmem:[%s2457_s3 + $0x48] sm:$0xff]  ;;  %v474_v13 = vld [vmem:[%s2457_s3 + $0x30] sm:$0xff] }
  0x11   :  { %1742 = vmatpush3.bf16.msra.mxu1 %v1880_v15  ;;  %v1621_v54 = vcombine.high %v476_v50, %v480_v51  ;;  %v481_v56 = vld [vmem:[%s2457_s3 + $0x68] sm:$0xff]  ;;  %v484_v57 = vld [vmem:[%s2457_s3 + $0x80] sm:$0xff]  ;;  %v1620_v62 = vcombine.low %v476_v50, %v480_v51  ;;  %v471_v14 = vld [vmem:[%s2457_s3 + $0x18] sm:$0xff]  ;;  %v1617_v15 = vcombine.high %v470_v12, %v474_v13 }
  0x12   :  { %1743 = vmatprep.subr.bf16.mxu1 %v1883_v18  ;;  %v1623_v58 = vcombine.high %v477_v55, %v481_v56  ;;  %v488_v59 = vld [vmem:[%s2457_s3 + $0xa0] sm:$0xff]  ;;  %v485_v60 = vld [vmem:[%s2457_s3 + $0x88] sm:$0xff]  ;;  %v1622_v63 = vcombine.low %v477_v55, %v481_v56  ;;  %v475_v16 = vld [vmem:[%s2457_s3 + $0x38] sm:$0xff] }
  0x13   :  { %1722 = vmatpush3.bf16.msra.mxu0 %v1882_v17  ;;  %v489_v61 = vld [vmem:[%s2457_s3 + $0xa8] sm:$0xff]  ;;  %v1629_v0 = vcombine.high %v484_v57, %v488_v59  ;;  %v1628_v2 = vcombine.low %v484_v57, %v488_v59  ;;  %v492_v4 = vld [vmem:[%s2457_s3 + $0xc0] sm:$0xff]  ;;  %v1616_v17 = vcombine.low %v470_v12, %v474_v13  ;;  %v1618_v18 = vcombine.low %v471_v14, %v475_v16  ;;  %v487_v49 = vld [vmem:[%s2457_s3 + $0x98] sm:$0xff] }
  0x14   :  { %1723 = vmatprep.subr.bf16.mxu0 %v1885_v20  ;;  %v1631_v1 = vcombine.high %v485_v60, %v489_v61  ;;  %v1630_v3 = vcombine.low %v485_v60, %v489_v61  ;;  %v496_v5 = vld [vmem:[%s2457_s3 + $0xe0] sm:$0xff]  ;;  %v493_v6 = vld [vmem:[%s2457_s3 + $0xc8] sm:$0xff]  ;;  %v1972_v20 = vmov 0   ;;  %v491_v50 = vld [vmem:[%s2457_s3 + $0xb8] sm:$0xff] }
  0x15   :  { %1744 = vmatpush3.bf16.msra.mxu1 %v1884_v19  ;;  %v1637_v7 = vcombine.high %v492_v4, %v496_v5  ;;  %v497_v8 = vld [vmem:[%s2457_s3 + $0xe8] sm:$0xff]  ;;  %v1636_v9 = vcombine.low %v492_v4, %v496_v5  ;;  %v1619_v19 = vcombine.high %v471_v14, %v475_v16  ;;  %v494_v55 = vld [vmem:[%s2457_s3 + $0xd0] sm:$0xff]  ;;  %v495_v57 = vld [vmem:[%s2457_s3 + $0xd8] sm:$0xff]  ;;  %v1634_v60 = vcombine.low %v487_v49, %v491_v50 }
  0x16   :  { %1745 = vmatprep.subr.bf16.mxu1 %v1887_v22  ;;  %v1638_v10 = vcombine.low %v493_v6, %v497_v8  ;;  %v1639_v11 = vcombine.high %v493_v6, %v497_v8  ;;  %v1569_v22 = vld [vmem:[%s2459_s2] ss:$0 sm:$0xff]  ;;  %v498_v56 = vld [vmem:[%s2457_s3 + $0xf0] sm:$0xff]  ;;  %v1910_v5 = vld [vmem:[%s2458_s5 + $0x48] sm:$0xff]  }
  0x17   :  { %1724 = vmatpush3.bf16.msra.mxu0 %v1886_v21  ;;  %v1641_v61 = vcombine.high %v494_v55, %v498_v56  ;;  %v1909_v4 = vld [vmem:[%s2458_s5 + $0x80] sm:$0xff]   ;;  %v1911_v6 = vld [vmem:[%s2458_s5 + $0xc8] sm:$0xff]   ;;  %v1917_v12 = vld [vmem:[%s2458_s5 + $0x90] sm:$0xff]  }
  0x18   :  { %1725 = vmatprep.subr.bf16.mxu0 %v1889_v24  ;;  %v1913_v8 = vld [vmem:[%s2458_s5 + $0x88] sm:$0xff]   ;;  %v1918_v13 = vld [vmem:[%s2458_s5 + $0x58] sm:$0xff]  }
  0x19   :  { %1746 = vmatpush3.bf16.msra.mxu1 %v1888_v23  ;;  %v1919_v14 = vld [vmem:[%s2458_s5 + $0xd8] sm:$0xff]  }
  0x1a   :  { %1747 = vmatprep.subr.bf16.mxu1 %v1891_v26  ;;  %v1921_v16 = vld [vmem:[%s2458_s5 + $0x98] sm:$0xff]  }
  0x1b   :  { %1726 = vmatpush3.bf16.msra.mxu0 %v1890_v25 }
  0x1c   :  { %1727 = vmatprep.subr.bf16.mxu0 %v1893_v28 }
  0x1d   :  { %1748 = vmatpush3.bf16.msra.mxu1 %v1892_v27 }
  0x1e   :  { %1749 = vmatprep.subr.bf16.mxu1 %v1895_v30 }
  0x1f   :  { %1728 = vmatpush3.bf16.msra.mxu0 %v1894_v29 }
  0x20   :  { %1850 = vmatprep.subr.bf16.mxu0 %v1970_v35 }
  0x21   :  { %1750 = vmatpush3.bf16.msra.mxu1 %v1899_v34 }
  0x22   :  { %379 = vmatmul.mubr.bf16.vlgmr.msra.gmra.mrb[0].mxu0 %v1570_v32  ;;  %705 = vmatprep.subr.bf16.mxu1 %v1613_v48  ;;  %v490_v48 = vld [vmem:[%s2457_s3 + $0xb0] sm:$0xff] }
  0x23   :  { %1851 = vmatpush3.bf16.msra.mxu0 %v1902_v39  ;;  %1858 = vmatprep.mubr.msk.bf16.mxu0 %vm1971_vm0, %v1970_v35  ;;  %v482_v39 = vld [vmem:[%s2457_s3 + $0x70] sm:$0xff] }
  0x24   :  { %419 = vmatmul.mubr.bf16.vlgmr.msra.gmra.mrb[0].mxu1 %v1572_v37  ;;  %1852 = vmatprep.subr.bf16.mxu0 %v1970_v35  ;;  %v478_v37 = vld [vmem:[%s2457_s3 + $0x50] sm:$0xff] }
  0x25   :  { %706 = vmatpush1.bf16.msra.mxu1 %v1612_v47  ;;  %737 = vmatprep.mubr.bf16.mxu1 %v1972_v20  ;;  %v1625_v45 = vcombine.high %v478_v37, %v482_v39  ;;  %v486_v47 = vld [vmem:[%s2457_s3 + $0x90] sm:$0xff]  ;;  %v1624_v51 = vcombine.low %v478_v37, %v482_v39  ;;  %v2343_v39 = vld [vmem:[%s2460_s4] sm:$0xff] }
  0x26   :  { %707 = vmatprep.subr.bf16.mxu1 %v1621_v54  ;;  %v1635_v54 = vcombine.high %v487_v49, %v491_v50  ;;  %v1632_v59 = vcombine.low %v486_v47, %v490_v48 }
  0x27   :  { %1853 = vmatpush3.bf16.msra.mxu0 %v1903_v40  ;;  %v479_v40 = vld [vmem:[%s2457_s3 + $0x58] sm:$0xff] }
  0x28   :  { %1854 = vmatprep.subr.bf16.mxu0 %v1970_v35 }
  0x29   :  { %708 = vmatpush1.bf16.msra.mxu1 %v1620_v62 }
  0x2a   :  { %709 = vmatprep.subr.bf16.mxu1 %v1629_v0 }
  0x2b   :  { %1855 = vmatpush3.bf16.msra.mxu0 %v1904_v41  ;;  %v483_v41 = vld [vmem:[%s2457_s3 + $0x78] sm:$0xff] }
  0x2c   :  { %1856 = vmatprep.subr.bf16.mxu0 %v1970_v35  ;;  %v1627_v46 = vcombine.high %v479_v40, %v483_v41 }
  0x2d   :  { %710 = vmatpush1.bf16.msra.mxu1 %v1628_v2  ;;  %v1907_v2 = vld [vmem:[%s2458_s5 + $0xc0] sm:$0xff]  }
  0x2e   :  { %711 = vmatprep.subr.bf16.mxu1 %v1637_v7  ;;  %v1912_v7 = vld [vmem:[%s2458_s5 + $0x8] sm:$0xff]  }
  0x2f   :  { %1857 = vmatpush3.bf16.msra.mxu0 %v1905_v42 }
  0x30   :  { %746 = vmatprep.subr.bf16.mxu0 %v1615_v53  ;;  %v1633_v53 = vcombine.high %v486_v47, %v490_v48 }
  0x31   :  { %712 = vmatpush1.bf16.msra.mxu1 %v1636_v9  ;;  %v1914_v9 = vld [vmem:[%s2458_s5 + $0x50] sm:$0xff]  }
  0x32   :  { %1859 = vmatmul.mubr.msk.bf16.vlgmr.msra.gmra.mrb[4].mxu0 %vm342_vm1, %v1898_v43  ;;  %787 = vmatprep.subr.bf16.mxu1 %v1617_v15  ;;  %v1920_v15 = vld [vmem:[%s2458_s5 + $0x18] sm:$0xff]  }
  0x33   :  { %747 = vmatpush1.bf16.msra.mxu0 %v1614_v52  ;;  %778 = vmatprep.mubr.bf16.mxu0 %v1972_v20  ;;  %v1626_v52 = vcombine.low %v479_v40, %v483_v41 }
  0x34   :  { %748 = vmatprep.subr.bf16.mxu0 %v1623_v58  ;;  %v499_v58 = vld [vmem:[%s2457_s3 + $0xf8] sm:$0xff] }
  0x35   :  { %v1643_v62 = vcombine.high %v495_v57, %v499_v58  ;;  %v1642_v0 = vcombine.low %v495_v57, %v499_v58 }
  0x37   :  { %749 = vmatpush1.bf16.msra.mxu0 %v1622_v63  ;;  %v1640_v63 = vcombine.low %v494_v55, %v498_v56 }
  0x38   :  { %750 = vmatprep.subr.bf16.mxu0 %v1631_v1  ;;  %v1906_v1 = vld [vmem:[%s2458_s5 + $0x40] sm:$0xff]  }
  0x3b   :  { %751 = vmatpush1.bf16.msra.mxu0 %v1630_v3  ;;  %v1908_v3 = vld [vmem:[%s2458_s5] sm:$0xff]  }
  0x3c   :  { %752 = vmatprep.subr.bf16.mxu0 %v1639_v11  ;;  %v1916_v11 = vld [vmem:[%s2458_s5 + $0x10] sm:$0xff]  }
  0x3f   :  { %753 = vmatpush1.bf16.msra.mxu0 %v1638_v10  ;;  %v1915_v10 = vld [vmem:[%s2458_s5 + $0xd0] sm:$0xff]  }
  0x40   :  { %828 = vmatprep.subr.bf16.mxu0 %v1619_v19  ;;  %v1924_v19 = vld [vmem:[%s2458_s5 + $0x20] sm:$0xff]  }
  0xf5   :  { %v1729_v21 = vpop.f32.mrb[0].mxu0 }
  0xf6   :  { %v1730_v23 = vpop.f32.mrb[1].mxu0 }
  0xf7   :  { %v1731_v24 = vadd.f32 %v1730_v23, %v1729_v21  ;;  %v1732_v25 = vpop.f32.mrb[2].mxu0  ;;  %v1751_v26 = vpop.f32.mrb[0].mxu1  ;;  %v1926_v21 = vld [vmem:[%s2458_s5 + $0x68] sm:$0xff]  }
  0xf8   :  { %v1733_v27 = vpop.f32.mrb[3].mxu0  ;;  %v1752_v28 = vpop.f32.mrb[1].mxu1  ;;  %v1928_v23 = vld [vmem:[%s2458_s5 + $0x28] sm:$0xff]   ;;  %v1930_v25 = vld [vmem:[%s2458_s5 + $0x70] sm:$0xff]  }
  0xf9   :  { %v381_v29 = vadd.f32 %v1731_v24, %v1569_v22  ;;  %v1753_v30 = vadd.f32 %v1752_v28, %v1751_v26  ;;  %v1754_v31 = vpop.f32.mrb[2].mxu1  ;;  %v1927_v22 = vld [vmem:[%s2458_s5 + $0xe8] sm:$0xff]   ;;  %v1931_v26 = vld [vmem:[%s2458_s5 + $0xf0] sm:$0xff]  }
  0xfa   :  { %v1755_v32 = vpop.f32.mrb[3].mxu1  ;;  %v1929_v24 = vld [vmem:[%s2458_s5 + $0xa8] sm:$0xff]   ;;  %v1932_v27 = vld [vmem:[%s2458_s5 + $0x30] sm:$0xff]   ;;  %v1936_v31 = vld [vmem:[%s2458_s5 + $0x38] sm:$0xff]  }
  0xfb   :  { %v421_v33 = vadd.f32 %v1753_v30, %v381_v29  ;;  %v1933_v28 = vld [vmem:[%s2458_s5 + $0xb0] sm:$0xff]   ;;  %v1934_v29 = vld [vmem:[%s2458_s5 + $0x78] sm:$0xff]  }
  0xfc   :  { %v1935_v30 = vld [vmem:[%s2458_s5 + $0xf8] sm:$0xff]  }
  0xfd   :  { %v1937_v32 = vld [vmem:[%s2458_s5 + $0xb8] sm:$0xff]  }
 0x105   :  { %v460_v34 = vpop.f32.mrb[4].mxu0 }
 0x106   :  { %v461_v35 = vadd.f32 %v460_v34, %v421_v33  ;;  %v1860_v36 = vpop.f32.mrb[5].mxu0  ;;  %v1938_v33 = vld [vmem:[%s2458_s5 + $0x140] sm:$0xff]  }
 0x107   :  { %v463_v38 = vpop.f32.mrb[6].mxu0  ;;  %v1939_v34 = vld [vmem:[%s2458_s5 + $0x1c0] sm:$0xff]  }
 0x108   :  { %v466_v42 = vmax.f32 %v461_v35, 0.0  ;;  %v1861_v43 = vpop.f32.mrb[7].mxu0  ;;  %v502_v35 = vlaneseq }
 0x10a   :  { %v467_v44 = vpack.c.bf16 %v466_v42, %v466_v42  ;;  %v2336_v36 = vshrl.u32 %v502_v35, 7 }
 0x10c   :  { %1644 = vmatmul.mubr.msk.bf16.vlgmr.msra.gmra.mrb[4].mxu1 %vm342_vm1, %v467_v44  ;;  %1645 = vmatmul.mubr.msk.bf16.vlgmr.msra.gmra.mrb[8].mxu0 %vm342_vm1, %v467_v44  ;;  %v504_v37 = vsub.s32 0, %v2336_v36  ;;  %v512_v38 = vsub.s32 2, %v2336_v36  ;;  %v508_v40 = vsub.s32 1, %v2336_v36  ;;  %v516_v41 = vsub.s32 3, %v2336_v36 }
 0x10d   :  { %788 = vmatpush1.bf16.msra.mxu1 %v1616_v17  ;;  %829 = vmatpush1.bf16.msra.mxu0 %v1618_v18  ;;  %v1922_v17 = vld [vmem:[%s2458_s5 + $0x60] sm:$0xff]  }
 0x10e   :  { %789 = vmatprep.subr.bf16.mxu1 %v1625_v45  ;;  %830 = vmatprep.subr.bf16.mxu0 %v1627_v46  ;;  %v1923_v18 = vld [vmem:[%s2458_s5 + $0xe0] sm:$0xff]   ;;  %v505_v42 = vrot.slane %v2343_v39, %v504_v37  ;;  %v513_v43 = vrot.slane %v2343_v39, %v512_v38  ;;  %v517_v45 = vrot.slane %v2343_v39, %v516_v41  ;;  %v528_v41 = vsub.s32 6, %v2336_v36 }
 0x10f   :  { %819 = vmatprep.mubr.bf16.mxu1 %v1972_v20  ;;  %860 = vmatprep.mubr.bf16.mxu0 %v1972_v20  ;;  %v1925_v20 = vld [vmem:[%s2458_s5 + $0xa0] sm:$0xff]  }
 0x110   :  { %v1956_v37 = vld [vmem:[%s2458_s5 + $0x120] sm:$0xff]  }
 0x111   :  { %790 = vmatpush1.bf16.msra.mxu1 %v1624_v51  ;;  %831 = vmatpush1.bf16.msra.mxu0 %v1626_v52  ;;  %v1957_v38 = vld [vmem:[%s2458_s5 + $0x1a0] sm:$0xff]  }
 0x112   :  { %791 = vmatprep.subr.bf16.mxu1 %v1633_v53  ;;  %832 = vmatprep.subr.bf16.mxu0 %v1635_v54 }
 0x115   :  { %792 = vmatpush1.bf16.msra.mxu1 %v1632_v59  ;;  %833 = vmatpush1.bf16.msra.mxu0 %v1634_v60 }
 0x116   :  { %793 = vmatprep.subr.bf16.mxu1 %v1641_v61  ;;  %834 = vmatprep.subr.bf16.mxu0 %v1643_v62 }
 0x119   :  { %794 = vmatpush1.bf16.msra.mxu1 %v1640_v63  ;;  %835 = vmatpush1.bf16.msra.mxu0 %v1642_v0  ;;  %v1940_v0 = vld [vmem:[%s2458_s5 + $0x100] sm:$0xff]  }
 0x11a   :  { %1762 = vmatprep.subr.bf16.mxu1 %v1906_v1  ;;  %1784 = vmatprep.subr.bf16.mxu0 %v1907_v2  ;;  %v1941_v1 = vld [vmem:[%s2458_s5 + $0x180] sm:$0xff]  }
 0x11c   :  { %1646 = vmatmul.mubr.msk.bf16.vlgmr.msra.gmra.mrb[8].mxu1 %vm342_vm1, %v467_v44  ;;  %1647 = vmatmul.mubr.msk.bf16.vlgmr.msra.gmra.mrb[12].mxu0 %vm342_vm1, %v467_v44  ;;  %v509_v44 = vrot.slane %v2343_v39, %v508_v40  ;;  %v520_v40 = vsub.s32 4, %v2336_v36 }
 0x11d   :  { %1763 = vmatpush3.bf16.msra.mxu1 %v1908_v3  ;;  %1785 = vmatpush3.bf16.msra.mxu0 %v1909_v4  ;;  %v1942_v4 = vld [vmem:[%s2458_s5 + $0x148] sm:$0xff]  }
 0x11e   :  { %1764 = vmatprep.subr.bf16.mxu1 %v1910_v5  ;;  %1786 = vmatprep.subr.bf16.mxu0 %v1911_v6  ;;  %v1943_v5 = vld [vmem:[%s2458_s5 + $0x1c8] sm:$0xff]  }
 0x11f   :  { %v1944_v6 = vld [vmem:[%s2458_s5 + $0x108] sm:$0xff]  }
 0x121   :  { %1765 = vmatpush3.bf16.msra.mxu1 %v1912_v7  ;;  %1787 = vmatpush3.bf16.msra.mxu0 %v1913_v8  ;;  %v1945_v7 = vld [vmem:[%s2458_s5 + $0x188] sm:$0xff]   ;;  %v524_v8 = vsub.s32 5, %v2336_v36 }
 0x122   :  { %1766 = vmatprep.subr.bf16.mxu1 %v1914_v9  ;;  %1788 = vmatprep.subr.bf16.mxu0 %v1915_v10  ;;  %v532_v9 = vsub.s32 7, %v2336_v36  ;;  %v1946_v10 = vld [vmem:[%s2458_s5 + $0x150] sm:$0xff]   ;;  %v1961_v36 = vld [vmem:[%s2458_s5 + $0x1a8] sm:$0xff]  }
 0x125   :  { %1767 = vmatpush3.bf16.msra.mxu1 %v1916_v11  ;;  %1789 = vmatpush3.bf16.msra.mxu0 %v1917_v12  ;;  %v1947_v11 = vld [vmem:[%s2458_s5 + $0x1d0] sm:$0xff]   ;;  %v525_v12 = vrot.slane %v2343_v39, %v524_v8 }
 0x126   :  { %1768 = vmatprep.subr.bf16.mxu1 %v1918_v13  ;;  %1790 = vmatprep.subr.bf16.mxu0 %v1919_v14  ;;  %v533_v13 = vrot.slane %v2343_v39, %v532_v9  ;;  %v1948_v14 = vld [vmem:[%s2458_s5 + $0x110] sm:$0xff]  }
 0x129   :  { %1769 = vmatpush3.bf16.msra.mxu1 %v1920_v15  ;;  %1791 = vmatpush3.bf16.msra.mxu0 %v1921_v16  ;;  %v1949_v15 = vld [vmem:[%s2458_s5 + $0x190] sm:$0xff]   ;;  %v1950_v16 = vld [vmem:[%s2458_s5 + $0x158] sm:$0xff]  }
 0x12a   :  { %1770 = vmatprep.subr.bf16.mxu1 %v1922_v17  ;;  %1792 = vmatprep.subr.bf16.mxu0 %v1923_v18  ;;  %v1951_v17 = vld [vmem:[%s2458_s5 + $0x1d8] sm:$0xff]  }
 0x12d   :  { %1771 = vmatpush3.bf16.msra.mxu1 %v1924_v19  ;;  %1793 = vmatpush3.bf16.msra.mxu0 %v1925_v20 }
 0x12e   :  { %1772 = vmatprep.subr.bf16.mxu1 %v1926_v21  ;;  %1794 = vmatprep.subr.bf16.mxu0 %v1927_v22 }
 0x131   :  { %1773 = vmatpush3.bf16.msra.mxu1 %v1928_v23  ;;  %1795 = vmatpush3.bf16.msra.mxu0 %v1929_v24 }
 0x132   :  { %1774 = vmatprep.subr.bf16.mxu1 %v1930_v25  ;;  %1796 = vmatprep.subr.bf16.mxu0 %v1931_v26  ;;  %v1952_v26 = vld [vmem:[%s2458_s5 + $0x118] sm:$0xff]  }
 0x135   :  { %1775 = vmatpush3.bf16.msra.mxu1 %v1932_v27  ;;  %1797 = vmatpush3.bf16.msra.mxu0 %v1933_v28  ;;  %v1953_v27 = vld [vmem:[%s2458_s5 + $0x198] sm:$0xff]  }
 0x136   :  { %1776 = vmatprep.subr.bf16.mxu1 %v1934_v29  ;;  %1798 = vmatprep.subr.bf16.mxu0 %v1935_v30  ;;  %v1954_v30 = vld [vmem:[%s2458_s5 + $0x160] sm:$0xff]  }
 0x139   :  { %1777 = vmatpush3.bf16.msra.mxu1 %v1936_v31  ;;  %1799 = vmatpush3.bf16.msra.mxu0 %v1937_v32  ;;  %v1955_v31 = vld [vmem:[%s2458_s5 + $0x1e0] sm:$0xff]  }
 0x13a   :  { %1806 = vmatprep.subr.bf16.mxu1 %v1938_v33  ;;  %1828 = vmatprep.subr.bf16.mxu0 %v1939_v34 }
 0x1df   :  { %v739_v46 = vpop.f32.mrb[4].mxu1  ;;  %v780_v47 = vpop.f32.mrb[8].mxu0 }
 0x1e0   :  { %v740_v48 = vadd.f32 %v739_v46, %v505_v42  ;;  %v781_v49 = vadd.f32 %v780_v47, %v513_v43  ;;  %v741_v50 = vpop.f32.mrb[5].mxu1  ;;  %v782_v51 = vpop.f32.mrb[9].mxu0  ;;  %v1958_v42 = vld [vmem:[%s2458_s5 + $0x168] sm:$0xff]   ;;  %v529_v46 = vrot.slane %v2343_v39, %v528_v41  ;;  %v1962_v47 = vld [vmem:[%s2458_s5 + $0x170] sm:$0xff]  }
 0x1e1   :  { %v742_v52 = vadd.f32 %v741_v50, %v509_v44  ;;  %v783_v53 = vadd.f32 %v782_v51, %v517_v45  ;;  %v743_v54 = vpop.f32.mrb[6].mxu1  ;;  %v784_v55 = vpop.f32.mrb[10].mxu0  ;;  %v1959_v43 = vld [vmem:[%s2458_s5 + $0x1e8] sm:$0xff]   ;;  %v521_v45 = vrot.slane %v2343_v39, %v520_v40  ;;  %v1965_v39 = vld [vmem:[%s2458_s5 + $0x1b0] sm:$0xff]  }
 0x1e2   :  { %v869_v56 = vmax.f32 %v740_v48, 0.0  ;;  %v871_v57 = vmax.f32 %v781_v49, 0.0  ;;  %v744_v58 = vpop.f32.mrb[7].mxu1  ;;  %v785_v59 = vpop.f32.mrb[11].mxu0  ;;  %v1960_v44 = vld [vmem:[%s2458_s5 + $0x128] sm:$0xff]   ;;  %v1963_v48 = vld [vmem:[%s2458_s5 + $0x1f0] sm:$0xff]  }
 0x1e3   :  { %v870_v60 = vmax.f32 %v742_v52, 0.0  ;;  %v872_v61 = vmax.f32 %v783_v53, 0.0  ;;  %v1964_v49 = vld [vmem:[%s2458_s5 + $0x130] sm:$0xff]   ;;  %v1966_v52 = vld [vmem:[%s2458_s5 + $0x178] sm:$0xff]  }
 0x1e4   :  { %v877_v2 = vpack.c.bf16 %v869_v56, %v869_v56  ;;  %v879_v3 = vpack.c.bf16 %v871_v57, %v871_v57  ;;  %v1967_v53 = vld [vmem:[%s2458_s5 + $0x1f8] sm:$0xff]  }
 0x1e5   :  { %v878_v62 = vpack.c.bf16 %v870_v60, %v870_v60  ;;  %v880_v63 = vpack.c.bf16 %v872_v61, %v872_v61  ;;  %v1968_v54 = vld [vmem:[%s2458_s5 + $0x138] sm:$0xff]  }
 0x1e6   :  { %v1969_v55 = vld [vmem:[%s2458_s5 + $0x1b8] sm:$0xff]  }
 0x1e7   :  { %1436 = vmatprep.mubr.bf16.mxu1 %v878_v62  ;;  %1476 = vmatprep.mubr.bf16.mxu0 %v880_v63  ;;  %v1648_v62 = vld [vmem:[%s2461_s6] ss:$0 sm:$0xff] }
 0x1e8   :  { %1437 = vmatmul.mubr.bf16.vlgmr.msra.gmra.mrb[12].mxu1 %v877_v2  ;;  %1477 = vmatmul.mubr.bf16.vlgmr.msra.gmra.mrb[16].mxu0 %v879_v3 }
 0x1e9   :  { %1807 = vmatpush3.bf16.msra.mxu1 %v1940_v0  ;;  %1829 = vmatpush3.bf16.msra.mxu0 %v1941_v1 }
 0x1ea   :  { %1808 = vmatprep.subr.bf16.mxu1 %v1942_v4  ;;  %1830 = vmatprep.subr.bf16.mxu0 %v1943_v5 }
 0x1ed   :  { %1809 = vmatpush3.bf16.msra.mxu1 %v1944_v6  ;;  %1831 = vmatpush3.bf16.msra.mxu0 %v1945_v7 }
 0x1ee   :  { %1810 = vmatprep.subr.bf16.mxu1 %v1946_v10  ;;  %1832 = vmatprep.subr.bf16.mxu0 %v1947_v11 }
 0x1ef   :  { %v821_v18 = vpop.f32.mrb[8].mxu1  ;;  %v862_v19 = vpop.f32.mrb[12].mxu0 }
 0x1f0   :  { %v823_v20 = vpop.f32.mrb[9].mxu1  ;;  %v864_v21 = vpop.f32.mrb[13].mxu0  ;;  %v822_v50 = vadd.f32 %v821_v18, %v521_v45  ;;  %v863_v51 = vadd.f32 %v862_v19, %v529_v46 }
 0x1f1   :  { %v824_v22 = vadd.f32 %v823_v20, %v525_v12  ;;  %v865_v23 = vadd.f32 %v864_v21, %v533_v13  ;;  %v825_v24 = vpop.f32.mrb[10].mxu1  ;;  %v866_v25 = vpop.f32.mrb[14].mxu0  ;;  %1811 = vmatpush3.bf16.msra.mxu1 %v1948_v14  ;;  %1833 = vmatpush3.bf16.msra.mxu0 %v1949_v15 }
 0x1f2   :  { %v826_v28 = vpop.f32.mrb[11].mxu1  ;;  %v867_v29 = vpop.f32.mrb[15].mxu0  ;;  %1812 = vmatprep.subr.bf16.mxu1 %v1950_v16  ;;  %1834 = vmatprep.subr.bf16.mxu0 %v1951_v17  ;;  %v873_v56 = vmax.f32 %v822_v50, 0.0  ;;  %v875_v57 = vmax.f32 %v863_v51, 0.0 }
 0x1f3   :  { %v874_v32 = vmax.f32 %v824_v22, 0.0  ;;  %v876_v33 = vmax.f32 %v865_v23, 0.0 }
 0x1f4   :  { %v881_v58 = vpack.c.bf16 %v873_v56, %v873_v56  ;;  %v883_v59 = vpack.c.bf16 %v875_v57, %v875_v57 }
 0x1f5   :  { %v882_v34 = vpack.c.bf16 %v874_v32, %v874_v32  ;;  %v884_v35 = vpack.c.bf16 %v876_v33, %v876_v33  ;;  %1813 = vmatpush3.bf16.msra.mxu1 %v1952_v26  ;;  %1835 = vmatpush3.bf16.msra.mxu0 %v1953_v27 }
 0x1f6   :  { %1814 = vmatprep.subr.bf16.mxu1 %v1954_v30  ;;  %1836 = vmatprep.subr.bf16.mxu0 %v1955_v31 }
 0x1f7   :  { %1516 = vmatprep.mubr.bf16.mxu1 %v882_v34  ;;  %1556 = vmatprep.mubr.bf16.mxu0 %v884_v35 }
 0x1f9   :  { %1815 = vmatpush3.bf16.msra.mxu1 %v1956_v37  ;;  %1837 = vmatpush3.bf16.msra.mxu0 %v1957_v38 }
 0x1fa   :  { %1816 = vmatprep.subr.bf16.mxu1 %v1958_v42  ;;  %1838 = vmatprep.subr.bf16.mxu0 %v1959_v43 }
 0x1fd   :  { %1817 = vmatpush3.bf16.msra.mxu1 %v1960_v44  ;;  %1839 = vmatpush3.bf16.msra.mxu0 %v1961_v36 }
 0x1fe   :  { %1818 = vmatprep.subr.bf16.mxu1 %v1962_v47  ;;  %1840 = vmatprep.subr.bf16.mxu0 %v1963_v48 }
 0x201   :  { %1819 = vmatpush3.bf16.msra.mxu1 %v1964_v49  ;;  %1841 = vmatpush3.bf16.msra.mxu0 %v1965_v39 }
 0x202   :  { %1820 = vmatprep.subr.bf16.mxu1 %v1966_v52  ;;  %1842 = vmatprep.subr.bf16.mxu0 %v1967_v53 }
 0x205   :  { %1821 = vmatpush3.bf16.msra.mxu1 %v1968_v54  ;;  %1843 = vmatpush3.bf16.msra.mxu0 %v1969_v55 }
 0x208   :  { %1517 = vmatmul.mubr.bf16.vlgmr.msra.gmra.mrb[16].mxu1 %v881_v58  ;;  %1557 = vmatmul.mubr.bf16.vlgmr.msra.gmra.mrb[20].mxu0 %v883_v59 }
 0x2bb   :  { %v1778_v60 = vpop.f32.mrb[12].mxu1  ;;  %v1800_v61 = vpop.f32.mrb[16].mxu0 }
 0x2bc   :  { %v1779_v63 = vpop.f32.mrb[13].mxu1  ;;  %v1801_v0 = vpop.f32.mrb[17].mxu0 }
 0x2bd   :  { %v1780_v1 = vadd.f32 %v1779_v63, %v1778_v60  ;;  %v1802_v2 = vadd.f32 %v1801_v0, %v1800_v61  ;;  %v1781_v3 = vpop.f32.mrb[14].mxu1  ;;  %v1803_v4 = vpop.f32.mrb[18].mxu0 }
 0x2be   :  { %v1782_v5 = vpop.f32.mrb[15].mxu1  ;;  %v1804_v6 = vpop.f32.mrb[19].mxu0 }
 0x2bf   :  { %v1439_v7 = vadd.f32 %v1780_v1, %v1648_v62 }
 0x2c1   :  { %v1479_v8 = vadd.f32 %v1802_v2, %v1439_v7 }
 0x2db   :  { %v1822_v9 = vpop.f32.mrb[16].mxu1  ;;  %v1844_v10 = vpop.f32.mrb[20].mxu0 }
 0x2dc   :  { %v1823_v11 = vpop.f32.mrb[17].mxu1  ;;  %v1845_v12 = vpop.f32.mrb[21].mxu0 }
 0x2dd   :  { %v1824_v13 = vadd.f32 %v1823_v11, %v1822_v9  ;;  %v1846_v14 = vadd.f32 %v1845_v12, %v1844_v10  ;;  %v1825_v15 = vpop.f32.mrb[18].mxu1  ;;  %v1847_v16 = vpop.f32.mrb[22].mxu0 }
 0x2de   :  { %v1826_v17 = vpop.f32.mrb[19].mxu1  ;;  %v1848_v18 = vpop.f32.mrb[23].mxu0 }
 0x2df   :  { %v1519_v19 = vadd.f32 %v1824_v13, %v1479_v8 }
 0x2e1   :  { %v1559_v20 = vadd.f32 %v1846_v14, %v1519_v19 }
 0x2e3   :  { %1564 = vst [vmem:[%s2462_s7] sm:$0xff] %v1559_v20 }

</bundles_post_ra>
